<compile_context>
chip_gen: v5e
topology: v5e:2x2
jax: 0.10.0
libtpu: 0.0.40
codegen_flags: <defaults>
</compile_context>

<pallas_src>
import functools

import jax
import jax.numpy as jnp
from jax.experimental import pallas as pl
from jax.experimental.pallas import tpu as pltpu


def _round_up(x, m):
    return ((x + m - 1) // m) * m


# ------------------------------ Pallas kernel ------------------------------ #

def _make_fused_lstm_kernel(num_layers, seq_len, batch_p, h_g, unroll):
    """Fused kernel: `num_layers` LSTM layers + FC head, one invocation.

    Ref layout (all whole-array VMEM blocks, no grid):
      inputs : x (T, Bp, D),
               per layer: w_ih (Din, 4*Hg), w_hh (Hg, 4*Hg), b (1, 4*Hg),
               then fc_w (Hg, Op), fc_b (1, Op)
      outputs: logits (Bp, Op)
      scratch: gx  (T, Bp, 4*Hg)  -- hoisted input-projection for current layer
               seq (T, Bp, Hg)    -- hidden sequence handed to next layer
                                     (only allocated when num_layers > 1)
    Gate column order inside 4*Hg is [i, f, o, g] (sigmoid gates contiguous).
    """
    g4 = 4 * h_g
    tb = seq_len * batch_p

    def kernel(*refs):
        x_ref = refs[0]
        layer_refs = refs[1:1 + 3 * num_layers]
        fcw_ref = refs[1 + 3 * num_layers]
        fcb_ref = refs[2 + 3 * num_layers]
        out_ref = refs[3 + 3 * num_layers]
        gx_sc = refs[4 + 3 * num_layers]
        seq_sc = refs[5 + 3 * num_layers] if num_layers > 1 else None

        bp, hg = batch_p, h_g

        def project_inputs(inp_flat, w_ih, bias):
            # ONE big matmul per layer (no recurrence dependence) + fused bias.
            gx = jnp.dot(inp_flat, w_ih, preferred_element_type=jnp.float32) + bias
            gx_sc[...] = gx.reshape(seq_len, bp, g4)

        def run_layer(w_hh, write_seq):
            def step(t, carry):
                h, c = carry
                gates = gx_sc[t] + jnp.dot(
                    h, w_hh, preferred_element_type=jnp.float32)   # (Bp, 4Hg)
                # One sigmoid over the 3 contiguous sigmoid gates, one tanh.
                sig = jax.nn.sigmoid(gates[:, :3 * hg])
                i_g = sig[:, 0 * hg:1 * hg]
                f_g = sig[:, 1 * hg:2 * hg]
                o_g = sig[:, 2 * hg:3 * hg]
                g_g = jnp.tanh(gates[:, 3 * hg:4 * hg])
                c_new = f_g * c + i_g * g_g
                h_new = o_g * jnp.tanh(c_new)
                if write_seq:
                    seq_sc[t] = h_new
                return (h_new, c_new)

            init = (jnp.zeros((bp, hg), jnp.float32),
                    jnp.zeros((bp, hg), jnp.float32))
            h_last, _ = jax.lax.fori_loop(0, seq_len, step, init, unroll=unroll)
            return h_last

        h_last = None
        for l in range(num_layers):
            w_ih = layer_refs[3 * l][...]
            w_hh = layer_refs[3 * l + 1][...]
            bias = layer_refs[3 * l + 2][...]           # (1, 4Hg), broadcasts
            if l == 0:
                inp_flat = x_ref[...].reshape(tb, x_ref.shape[2])
            else:
                inp_flat = seq_sc[...].reshape(tb, hg)
            project_inputs(inp_flat, w_ih, bias)
            h_last = run_layer(w_hh, write_seq=(l != num_layers - 1))

        # FC head fused in; output lane-dense (Op is a multiple of 128).
        out_ref[...] = (
            jnp.dot(h_last, fcw_ref[...], preferred_element_type=jnp.float32)
            + fcb_ref[...]
        ).astype(out_ref.dtype)

    return kernel


# ------------------------- Parameter preparation --------------------------- #

def prepare_params(params, input_dim, hidden_dim, layer_dim, output_dim):
    """One-time prep: transpose, reorder gates to [i,f,o,g], (conditionally)
    pad, and fuse b_ih + b_hh."""
    H = hidden_dim
    # Conditional per-gate padding: no pad when H < 128 (unaligned slices are
    # far cheaper than 4x everything); aligned pad when H >= 128.
    Hg = H if H < 128 else _round_up(H, 128)
    Op = _round_up(output_dim, 128)

    def reorder_gate_cols(w):
        # w: (rows, 4H), column blocks in PyTorch order [i, f, g, o].
        i_, f_, g_, o_ = jnp.split(w, 4, axis=-1)
        blocks = [i_, f_, o_, g_]          # sigmoid gates first, tanh gate last
        if Hg != H:
            blocks = [jnp.pad(b, ((0, 0), (0, Hg - H))) for b in blocks]
        return jnp.concatenate(blocks, axis=-1)        # (rows, 4*Hg)

    layers = []
    for l in range(layer_dim):
        p = params["lstm"][l]
        w_ih = reorder_gate_cols(jnp.transpose(p["w_ih"]))       # (Din, 4Hg)
        w_hh = reorder_gate_cols(jnp.transpose(p["w_hh"]))       # (H,   4Hg)
        bias = reorder_gate_cols(
            (p["b_ih"] + p["b_hh"]).reshape(1, -1))              # (1,   4Hg)
        if Hg != H:
            w_hh = jnp.pad(w_hh, ((0, Hg - H), (0, 0)))          # (Hg,  4Hg)
            if l > 0:
                w_ih = jnp.pad(w_ih, ((0, Hg - H), (0, 0)))      # (Hg,  4Hg)
        layers.append((w_ih, w_hh, bias))

    fc_w = jnp.pad(jnp.transpose(params["fc_w"]),
                   ((0, Hg - H), (0, Op - output_dim)))          # (Hg, Op)
    fc_b = jnp.pad(params["fc_b"].reshape(1, -1),
                   ((0, 0), (0, Op - output_dim)))               # (1,  Op)
    return {"layers": layers, "fc_w": fc_w, "fc_b": fc_b}


# --------------------------------- Forward --------------------------------- #

@functools.partial(jax.jit, static_argnames=("output_dim",))
def lstm_classifier_forward(x, prepped, *, output_dim):
    """Forward matching LSTMClassifier.forward. x: (B, T, input_dim) -> (B, O)."""
    B, T, D = x.shape
    layers = prepped["layers"]
    num_layers = len(layers)
    Hg = layers[0][1].shape[0]           # (padded) hidden width (w_hh rows)
    G4 = layers[0][1].shape[1]           # 4 * Hg
    Op = prepped["fc_w"].shape[1]        # padded output size
    Bp = _round_up(max(B, 8), 8)         # sublane-multiple batch

    # Time-major + batch pad so (T, Bp, D) -> (T*Bp, D) flattening is layout-free.
    x_tm = jnp.transpose(x, (1, 0, 2))                        # (T, B, D)
    if Bp != B:
        x_tm = jnp.pad(x_tm, ((0, 0), (0, Bp - B), (0, 0)))   # (T, Bp, D)

    inputs = [x_tm]
    for (w_ih, w_hh, b) in layers:
        inputs += [w_ih, w_hh, b]
    inputs += [prepped["fc_w"], prepped["fc_b"]]

    scratch = [pltpu.VMEM((T, Bp, G4), jnp.float32)]          # gx
    if num_layers > 1:
        scratch.append(pltpu.VMEM((T, Bp, Hg), jnp.float32))  # seq

    # Explicit VMEM budget (resident set + headroom), clamped to v7x's 64 MiB.
    weight_elems = sum(w_ih.size + w_hh.size + b.size for (w_ih, w_hh, b) in layers)
    weight_elems += prepped["fc_w"].size + prepped["fc_b"].size
    bytes_needed = 4 * (
        T * Bp * D + weight_elems + Bp * Op
        + T * Bp * G4 + (T * Bp * Hg if num_layers > 1 else 0))
    vmem_limit = int(min(max(2 * bytes_needed + (2 << 20), 8 << 20), 64 << 20))

    kernel = _make_fused_lstm_kernel(num_layers, T, Bp, Hg, unroll=min(T, 8))
    out_pad = pl.pallas_call(
        kernel,
        out_shape=jax.ShapeDtypeStruct((Bp, Op), jnp.float32),
        scratch_shapes=scratch,
        compiler_params=pltpu.CompilerParams(vmem_limit_bytes=vmem_limit),
    )(*inputs)
    return out_pad[:B, :output_dim]


# ------------------------- Parameter initialization ------------------------ #

def init_params(key, input_dim, hidden_dim, layer_dim, output_dim):
    """Deterministic init, PyTorch-style U(-1/sqrt(H), 1/sqrt(H))."""
    k = 1.0 / jnp.sqrt(jnp.float32(hidden_dim))
    params = {"lstm": []}
    for l in range(layer_dim):
        d_in = input_dim if l == 0 else hidden_dim
        key, k1, k2, k3, k4 = jax.random.split(key, 5)
        params["lstm"].append({
            "w_ih": jax.random.uniform(k1, (4 * hidden_dim, d_in), jnp.float32, -k, k),
            "w_hh": jax.random.uniform(k2, (4 * hidden_dim, hidden_dim), jnp.float32, -k, k),
            "b_ih": jax.random.uniform(k3, (4 * hidden_dim,), jnp.float32, -k, k),
            "b_hh": jax.random.uniform(k4, (4 * hidden_dim,), jnp.float32, -k, k),
        })
    key, k5, k6 = jax.random.split(key, 3)
    params["fc_w"] = jax.random.uniform(k5, (output_dim, hidden_dim), jnp.float32, -k, k)
    params["fc_b"] = jax.random.uniform(k6, (output_dim,), jnp.float32, -k, k)
    return params


# --------------------------- Pure-JAX reference ----------------------------- #

def reference_forward(x, params, layer_dim):
    B, T, _ = x.shape
    H = params["lstm"][0]["w_hh"].shape[1]
    seq = jnp.transpose(x, (1, 0, 2))
    for l in range(layer_dim):
        p = params["lstm"][l]

        def step(carry, x_t):
            h, c = carry
            g = x_t @ p["w_ih"].T + h @ p["w_hh"].T + p["b_ih"] + p["b_hh"]
            i = jax.nn.sigmoid(g[:, 0 * H:1 * H])
            f = jax.nn.sigmoid(g[:, 1 * H:2 * H])
            gg = jnp.tanh(g[:, 2 * H:3 * H])
            o = jax.nn.sigmoid(g[:, 3 * H:4 * H])
            c = f * c + i * gg
            h = o * jnp.tanh(c)
            return (h, c), h

        init = (jnp.zeros((B, H), jnp.float32), jnp.zeros((B, H), jnp.float32))
        _, seq = jax.lax.scan(step, init, seq)
    return seq[-1] @ params["fc_w"].T + params["fc_b"]


# --------------------------------- Main ------------------------------------ #

if __name__ == "__main__":
    B, T = 2, 8
    INPUT_DIM, HIDDEN_DIM, LAYER_DIM, OUTPUT_DIM = 16, 32, 2, 4

    key = jax.random.PRNGKey(0)
    key, xkey = jax.random.split(key)
    x = jax.random.normal(xkey, (B, T, INPUT_DIM), jnp.float32)

    params = init_params(key, INPUT_DIM, HIDDEN_DIM, LAYER_DIM, OUTPUT_DIM)
    prepped = prepare_params(params, INPUT_DIM, HIDDEN_DIM, LAYER_DIM, OUTPUT_DIM)

    out = lstm_classifier_forward(x, prepped, output_dim=OUTPUT_DIM)
    out = jax.block_until_ready(out)

    ref = reference_forward(x, params, LAYER_DIM)
    assert out.shape == (B, OUTPUT_DIM)
    assert jnp.allclose(out, ref, atol=1e-4, rtol=1e-4), "mismatch vs reference"

    print("KERNEL_OK")
</pallas_src>

<mosaic_0001>
module attributes {stable_mosaic.version = 11 : i64} {
  func.func @kernel(%arg0: memref<8x8x16xf32, #tpu.memory_space<vmem>>, %arg1: memref<16x128xf32, #tpu.memory_space<vmem>>, %arg2: memref<32x128xf32, #tpu.memory_space<vmem>>, %arg3: memref<1x128xf32, #tpu.memory_space<vmem>>, %arg4: memref<32x128xf32, #tpu.memory_space<vmem>>, %arg5: memref<32x128xf32, #tpu.memory_space<vmem>>, %arg6: memref<1x128xf32, #tpu.memory_space<vmem>>, %arg7: memref<32x128xf32, #tpu.memory_space<vmem>>, %arg8: memref<1x128xf32, #tpu.memory_space<vmem>>, %arg9: memref<8x128xf32, #tpu.memory_space<vmem>>, %arg10: memref<8x8x128xf32, #tpu.memory_space<vmem>>, %arg11: memref<8x8x32xf32, #tpu.memory_space<vmem>>) attributes {dimension_semantics = [], scalar_prefetch = 0 : i64, scratch_operands = 2 : i64, tpu.core_type = #tpu.core_type<tc>} {
    %c0 = arith.constant 0 : index
    %c0_0 = arith.constant 0 : index
    %0 = vector.load %arg1[%c0, %c0_0] : memref<16x128xf32, #tpu.memory_space<vmem>>, vector<16x128xf32>
    %c0_1 = arith.constant 0 : index
    %c0_2 = arith.constant 0 : index
    %1 = vector.load %arg2[%c0_1, %c0_2] : memref<32x128xf32, #tpu.memory_space<vmem>>, vector<32x128xf32>
    %c0_3 = arith.constant 0 : index
    %c0_4 = arith.constant 0 : index
    %2 = vector.load %arg3[%c0_3, %c0_4] : memref<1x128xf32, #tpu.memory_space<vmem>>, vector<1x128xf32>
    %c0_5 = arith.constant 0 : index
    %c0_6 = arith.constant 0 : index
    %c0_7 = arith.constant 0 : index
    %3 = vector.load %arg0[%c0_5, %c0_6, %c0_7] : memref<8x8x16xf32, #tpu.memory_space<vmem>>, vector<8x8x16xf32>
    %4 = vector.shape_cast %3 : vector<8x8x16xf32> to vector<64x16xf32>
    %cst = arith.constant dense<0.000000e+00> : vector<64x128xf32>
    %5 = tpu.matmul %4, %0, %cst {dimension_numbers = #tpu.dot_dimension_numbers<[1], [0], [0], [1], [0, 0, 1, 1], [], []>} : vector<64x16xf32>, vector<16x128xf32>, vector<64x128xf32> -> vector<64x128xf32>
    %6 = vector.broadcast %2 : vector<1x128xf32> to vector<64x128xf32>
    %7 = arith.addf %5, %6 : vector<64x128xf32>
    %8 = vector.shape_cast %7 : vector<64x128xf32> to vector<8x8x128xf32>
    %c0_8 = arith.constant 0 : index
    %c0_9 = arith.constant 0 : index
    %c0_10 = arith.constant 0 : index
    %9 = vector.load %arg10[%c0_8, %c0_9, %c0_10] : memref<8x8x128xf32, #tpu.memory_space<vmem>>, vector<8x8x128xf32>
    tpu.vector_store %arg10[%c0_8, %c0_9, %c0_10], %8 {strides = array<i32>} : memref<8x8x128xf32, #tpu.memory_space<vmem>>, vector<8x8x128xf32>,
    %cst_11 = arith.constant 0.000000e+00 : f32
    %10 = vector.broadcast %cst_11 : f32 to vector<8x32xf32>
    %cst_12 = arith.constant 0.000000e+00 : f32
    %11 = vector.broadcast %cst_12 : f32 to vector<8x32xf32>
    %c0_i32 = arith.constant 0 : i32
    %12 = arith.index_cast %c0_i32 : i32 to index
    %c0_13 = arith.constant 0 : index
    %c0_14 = arith.constant 0 : index
    %13 = vector.load %arg10[%12, %c0_13, %c0_14] : memref<8x8x128xf32, #tpu.memory_space<vmem>>, vector<1x8x128xf32>
    %14 = vector.shape_cast %13 : vector<1x8x128xf32> to vector<8x128xf32>
    %cst_15 = arith.constant dense<0.000000e+00> : vector<8x128xf32>
    %15 = tpu.matmul %10, %1, %cst_15 {dimension_numbers = #tpu.dot_dimension_numbers<[1], [0], [0], [1], [0, 0, 1, 1], [], []>} : vector<8x32xf32>, vector<32x128xf32>, vector<8x128xf32> -> vector<8x128xf32>
    %16 = arith.addf %14, %15 : vector<8x128xf32>
    %17 = vector.extract_strided_slice %16 {offsets = [0, 0], sizes = [8, 96], strides = [1, 1]} : vector<8x128xf32> to vector<8x96xf32>
    %18 = arith.negf %17 : vector<8x96xf32>
    %19 = math.exp %18 : vector<8x96xf32>
    %cst_16 = arith.constant 1.000000e+00 : f32
    %20 = vector.broadcast %cst_16 : f32 to vector<8x96xf32>
    %21 = arith.addf %20, %19 : vector<8x96xf32>
    %22 = arith.divf %20, %21 : vector<8x96xf32>
    %23 = vector.extract_strided_slice %22 {offsets = [0, 0], sizes = [8, 32], strides = [1, 1]} : vector<8x96xf32> to vector<8x32xf32>
    %24 = vector.extract_strided_slice %22 {offsets = [0, 32], sizes = [8, 32], strides = [1, 1]} : vector<8x96xf32> to vector<8x32xf32>
    %25 = vector.extract_strided_slice %22 {offsets = [0, 64], sizes = [8, 32], strides = [1, 1]} : vector<8x96xf32> to vector<8x32xf32>
    %26 = vector.extract_strided_slice %16 {offsets = [0, 96], sizes = [8, 32], strides = [1, 1]} : vector<8x128xf32> to vector<8x32xf32>
    %27 = math.tanh %26 : vector<8x32xf32>
    %28 = arith.mulf %24, %11 : vector<8x32xf32>
    %29 = arith.mulf %23, %27 : vector<8x32xf32>
    %30 = arith.addf %28, %29 : vector<8x32xf32>
    %31 = math.tanh %30 : vector<8x32xf32>
    %32 = arith.mulf %25, %31 : vector<8x32xf32>
    %33 = arith.index_cast %c0_i32 : i32 to index
    %c0_17 = arith.constant 0 : index
    %c0_18 = arith.constant 0 : index
    %34 = vector.load %arg11[%33, %c0_17, %c0_18] : memref<8x8x32xf32, #tpu.memory_space<vmem>>, vector<1x8x32xf32>
    %35 = vector.shape_cast %34 : vector<1x8x32xf32> to vector<8x32xf32>
    %36 = vector.shape_cast %32 : vector<8x32xf32> to vector<1x8x32xf32>
    tpu.vector_store %arg11[%33, %c0_17, %c0_18], %36 {strides = array<i32>} : memref<8x8x32xf32, #tpu.memory_space<vmem>>, vector<1x8x32xf32>,
    %c1_i32 = arith.constant 1 : i32
    %37 = arith.index_cast %c1_i32 : i32 to index
    %c0_19 = arith.constant 0 : index
    %c0_20 = arith.constant 0 : index
    %38 = vector.load %arg10[%37, %c0_19, %c0_20] : memref<8x8x128xf32, #tpu.memory_space<vmem>>, vector<1x8x128xf32>
    %39 = vector.shape_cast %38 : vector<1x8x128xf32> to vector<8x128xf32>
    %cst_21 = arith.constant dense<0.000000e+00> : vector<8x128xf32>
    %40 = tpu.matmul %32, %1, %cst_21 {dimension_numbers = #tpu.dot_dimension_numbers<[1], [0], [0], [1], [0, 0, 1, 1], [], []>} : vector<8x32xf32>, vector<32x128xf32>, vector<8x128xf32> -> vector<8x128xf32>
    %41 = arith.addf %39, %40 : vector<8x128xf32>
    %42 = vector.extract_strided_slice %41 {offsets = [0, 0], sizes = [8, 96], strides = [1, 1]} : vector<8x128xf32> to vector<8x96xf32>
    %43 = arith.negf %42 : vector<8x96xf32>
    %44 = math.exp %43 : vector<8x96xf32>
    %cst_22 = arith.constant 1.000000e+00 : f32
    %45 = vector.broadcast %cst_22 : f32 to vector<8x96xf32>
    %46 = arith.addf %45, %44 : vector<8x96xf32>
    %47 = arith.divf %45, %46 : vector<8x96xf32>
    %48 = vector.extract_strided_slice %47 {offsets = [0, 0], sizes = [8, 32], strides = [1, 1]} : vector<8x96xf32> to vector<8x32xf32>
    %49 = vector.extract_strided_slice %47 {offsets = [0, 32], sizes = [8, 32], strides = [1, 1]} : vector<8x96xf32> to vector<8x32xf32>
    %50 = vector.extract_strided_slice %47 {offsets = [0, 64], sizes = [8, 32], strides = [1, 1]} : vector<8x96xf32> to vector<8x32xf32>
    %51 = vector.extract_strided_slice %41 {offsets = [0, 96], sizes = [8, 32], strides = [1, 1]} : vector<8x128xf32> to vector<8x32xf32>
    %52 = math.tanh %51 : vector<8x32xf32>
    %53 = arith.mulf %49, %30 : vector<8x32xf32>
    %54 = arith.mulf %48, %52 : vector<8x32xf32>
    %55 = arith.addf %53, %54 : vector<8x32xf32>
    %56 = math.tanh %55 : vector<8x32xf32>
    %57 = arith.mulf %50, %56 : vector<8x32xf32>
    %58 = arith.index_cast %c1_i32 : i32 to index
    %c0_23 = arith.constant 0 : index
    %c0_24 = arith.constant 0 : index
    %59 = vector.load %arg11[%58, %c0_23, %c0_24] : memref<8x8x32xf32, #tpu.memory_space<vmem>>, vector<1x8x32xf32>
    %60 = vector.shape_cast %59 : vector<1x8x32xf32> to vector<8x32xf32>
    %61 = vector.shape_cast %57 : vector<8x32xf32> to vector<1x8x32xf32>
    tpu.vector_store %arg11[%58, %c0_23, %c0_24], %61 {strides = array<i32>} : memref<8x8x32xf32, #tpu.memory_space<vmem>>, vector<1x8x32xf32>,
    %c2_i32 = arith.constant 2 : i32
    %62 = arith.index_cast %c2_i32 : i32 to index
    %c0_25 = arith.constant 0 : index
    %c0_26 = arith.constant 0 : index
    %63 = vector.load %arg10[%62, %c0_25, %c0_26] : memref<8x8x128xf32, #tpu.memory_space<vmem>>, vector<1x8x128xf32>
    %64 = vector.shape_cast %63 : vector<1x8x128xf32> to vector<8x128xf32>
    %cst_27 = arith.constant dense<0.000000e+00> : vector<8x128xf32>
    %65 = tpu.matmul %57, %1, %cst_27 {dimension_numbers = #tpu.dot_dimension_numbers<[1], [0], [0], [1], [0, 0, 1, 1], [], []>} : vector<8x32xf32>, vector<32x128xf32>, vector<8x128xf32> -> vector<8x128xf32>
    %66 = arith.addf %64, %65 : vector<8x128xf32>
    %67 = vector.extract_strided_slice %66 {offsets = [0, 0], sizes = [8, 96], strides = [1, 1]} : vector<8x128xf32> to vector<8x96xf32>
    %68 = arith.negf %67 : vector<8x96xf32>
    %69 = math.exp %68 : vector<8x96xf32>
    %cst_28 = arith.constant 1.000000e+00 : f32
    %70 = vector.broadcast %cst_28 : f32 to vector<8x96xf32>
    %71 = arith.addf %70, %69 : vector<8x96xf32>
    %72 = arith.divf %70, %71 : vector<8x96xf32>
    %73 = vector.extract_strided_slice %72 {offsets = [0, 0], sizes = [8, 32], strides = [1, 1]} : vector<8x96xf32> to vector<8x32xf32>
    %74 = vector.extract_strided_slice %72 {offsets = [0, 32], sizes = [8, 32], strides = [1, 1]} : vector<8x96xf32> to vector<8x32xf32>
    %75 = vector.extract_strided_slice %72 {offsets = [0, 64], sizes = [8, 32], strides = [1, 1]} : vector<8x96xf32> to vector<8x32xf32>
    %76 = vector.extract_strided_slice %66 {offsets = [0, 96], sizes = [8, 32], strides = [1, 1]} : vector<8x128xf32> to vector<8x32xf32>
    %77 = math.tanh %76 : vector<8x32xf32>
    %78 = arith.mulf %74, %55 : vector<8x32xf32>
    %79 = arith.mulf %73, %77 : vector<8x32xf32>
    %80 = arith.addf %78, %79 : vector<8x32xf32>
    %81 = math.tanh %80 : vector<8x32xf32>
    %82 = arith.mulf %75, %81 : vector<8x32xf32>
    %83 = arith.index_cast %c2_i32 : i32 to index
    %c0_29 = arith.constant 0 : index
    %c0_30 = arith.constant 0 : index
    %84 = vector.load %arg11[%83, %c0_29, %c0_30] : memref<8x8x32xf32, #tpu.memory_space<vmem>>, vector<1x8x32xf32>
    %85 = vector.shape_cast %84 : vector<1x8x32xf32> to vector<8x32xf32>
    %86 = vector.shape_cast %82 : vector<8x32xf32> to vector<1x8x32xf32>
    tpu.vector_store %arg11[%83, %c0_29, %c0_30], %86 {strides = array<i32>} : memref<8x8x32xf32, #tpu.memory_space<vmem>>, vector<1x8x32xf32>,
    %c3_i32 = arith.constant 3 : i32
    %87 = arith.index_cast %c3_i32 : i32 to index
    %c0_31 = arith.constant 0 : index
    %c0_32 = arith.constant 0 : index
    %88 = vector.load %arg10[%87, %c0_31, %c0_32] : memref<8x8x128xf32, #tpu.memory_space<vmem>>, vector<1x8x128xf32>
    %89 = vector.shape_cast %88 : vector<1x8x128xf32> to vector<8x128xf32>
    %cst_33 = arith.constant dense<0.000000e+00> : vector<8x128xf32>
    %90 = tpu.matmul %82, %1, %cst_33 {dimension_numbers = #tpu.dot_dimension_numbers<[1], [0], [0], [1], [0, 0, 1, 1], [], []>} : vector<8x32xf32>, vector<32x128xf32>, vector<8x128xf32> -> vector<8x128xf32>
    %91 = arith.addf %89, %90 : vector<8x128xf32>
    %92 = vector.extract_strided_slice %91 {offsets = [0, 0], sizes = [8, 96], strides = [1, 1]} : vector<8x128xf32> to vector<8x96xf32>
    %93 = arith.negf %92 : vector<8x96xf32>
    %94 = math.exp %93 : vector<8x96xf32>
    %cst_34 = arith.constant 1.000000e+00 : f32
    %95 = vector.broadcast %cst_34 : f32 to vector<8x96xf32>
    %96 = arith.addf %95, %94 : vector<8x96xf32>
    %97 = arith.divf %95, %96 : vector<8x96xf32>
    %98 = vector.extract_strided_slice %97 {offsets = [0, 0], sizes = [8, 32], strides = [1, 1]} : vector<8x96xf32> to vector<8x32xf32>
    %99 = vector.extract_strided_slice %97 {offsets = [0, 32], sizes = [8, 32], strides = [1, 1]} : vector<8x96xf32> to vector<8x32xf32>
    %100 = vector.extract_strided_slice %97 {offsets = [0, 64], sizes = [8, 32], strides = [1, 1]} : vector<8x96xf32> to vector<8x32xf32>
    %101 = vector.extract_strided_slice %91 {offsets = [0, 96], sizes = [8, 32], strides = [1, 1]} : vector<8x128xf32> to vector<8x32xf32>
    %102 = math.tanh %101 : vector<8x32xf32>
    %103 = arith.mulf %99, %80 : vector<8x32xf32>
    %104 = arith.mulf %98, %102 : vector<8x32xf32>
    %105 = arith.addf %103, %104 : vector<8x32xf32>
    %106 = math.tanh %105 : vector<8x32xf32>
    %107 = arith.mulf %100, %106 : vector<8x32xf32>
    %108 = arith.index_cast %c3_i32 : i32 to index
    %c0_35 = arith.constant 0 : index
    %c0_36 = arith.constant 0 : index
    %109 = vector.load %arg11[%108, %c0_35, %c0_36] : memref<8x8x32xf32, #tpu.memory_space<vmem>>, vector<1x8x32xf32>
    %110 = vector.shape_cast %109 : vector<1x8x32xf32> to vector<8x32xf32>
    %111 = vector.shape_cast %107 : vector<8x32xf32> to vector<1x8x32xf32>
    tpu.vector_store %arg11[%108, %c0_35, %c0_36], %111 {strides = array<i32>} : memref<8x8x32xf32, #tpu.memory_space<vmem>>, vector<1x8x32xf32>,
    %c4_i32 = arith.constant 4 : i32
    %112 = arith.index_cast %c4_i32 : i32 to index
    %c0_37 = arith.constant 0 : index
    %c0_38 = arith.constant 0 : index
    %113 = vector.load %arg10[%112, %c0_37, %c0_38] : memref<8x8x128xf32, #tpu.memory_space<vmem>>, vector<1x8x128xf32>
    %114 = vector.shape_cast %113 : vector<1x8x128xf32> to vector<8x128xf32>
    %cst_39 = arith.constant dense<0.000000e+00> : vector<8x128xf32>
    %115 = tpu.matmul %107, %1, %cst_39 {dimension_numbers = #tpu.dot_dimension_numbers<[1], [0], [0], [1], [0, 0, 1, 1], [], []>} : vector<8x32xf32>, vector<32x128xf32>, vector<8x128xf32> -> vector<8x128xf32>
    %116 = arith.addf %114, %115 : vector<8x128xf32>
    %117 = vector.extract_strided_slice %116 {offsets = [0, 0], sizes = [8, 96], strides = [1, 1]} : vector<8x128xf32> to vector<8x96xf32>
    %118 = arith.negf %117 : vector<8x96xf32>
    %119 = math.exp %118 : vector<8x96xf32>
    %cst_40 = arith.constant 1.000000e+00 : f32
    %120 = vector.broadcast %cst_40 : f32 to vector<8x96xf32>
    %121 = arith.addf %120, %119 : vector<8x96xf32>
    %122 = arith.divf %120, %121 : vector<8x96xf32>
    %123 = vector.extract_strided_slice %122 {offsets = [0, 0], sizes = [8, 32], strides = [1, 1]} : vector<8x96xf32> to vector<8x32xf32>
    %124 = vector.extract_strided_slice %122 {offsets = [0, 32], sizes = [8, 32], strides = [1, 1]} : vector<8x96xf32> to vector<8x32xf32>
    %125 = vector.extract_strided_slice %122 {offsets = [0, 64], sizes = [8, 32], strides = [1, 1]} : vector<8x96xf32> to vector<8x32xf32>
    %126 = vector.extract_strided_slice %116 {offsets = [0, 96], sizes = [8, 32], strides = [1, 1]} : vector<8x128xf32> to vector<8x32xf32>
    %127 = math.tanh %126 : vector<8x32xf32>
    %128 = arith.mulf %124, %105 : vector<8x32xf32>
    %129 = arith.mulf %123, %127 : vector<8x32xf32>
    %130 = arith.addf %128, %129 : vector<8x32xf32>
    %131 = math.tanh %130 : vector<8x32xf32>
    %132 = arith.mulf %125, %131 : vector<8x32xf32>
    %133 = arith.index_cast %c4_i32 : i32 to index
    %c0_41 = arith.constant 0 : index
    %c0_42 = arith.constant 0 : index
    %134 = vector.load %arg11[%133, %c0_41, %c0_42] : memref<8x8x32xf32, #tpu.memory_space<vmem>>, vector<1x8x32xf32>
    %135 = vector.shape_cast %134 : vector<1x8x32xf32> to vector<8x32xf32>
    %136 = vector.shape_cast %132 : vector<8x32xf32> to vector<1x8x32xf32>
    tpu.vector_store %arg11[%133, %c0_41, %c0_42], %136 {strides = array<i32>} : memref<8x8x32xf32, #tpu.memory_space<vmem>>, vector<1x8x32xf32>,
    %c5_i32 = arith.constant 5 : i32
    %137 = arith.index_cast %c5_i32 : i32 to index
    %c0_43 = arith.constant 0 : index
    %c0_44 = arith.constant 0 : index
    %138 = vector.load %arg10[%137, %c0_43, %c0_44] : memref<8x8x128xf32, #tpu.memory_space<vmem>>, vector<1x8x128xf32>
    %139 = vector.shape_cast %138 : vector<1x8x128xf32> to vector<8x128xf32>
    %cst_45 = arith.constant dense<0.000000e+00> : vector<8x128xf32>
    %140 = tpu.matmul %132, %1, %cst_45 {dimension_numbers = #tpu.dot_dimension_numbers<[1], [0], [0], [1], [0, 0, 1, 1], [], []>} : vector<8x32xf32>, vector<32x128xf32>, vector<8x128xf32> -> vector<8x128xf32>
    %141 = arith.addf %139, %140 : vector<8x128xf32>
    %142 = vector.extract_strided_slice %141 {offsets = [0, 0], sizes = [8, 96], strides = [1, 1]} : vector<8x128xf32> to vector<8x96xf32>
    %143 = arith.negf %142 : vector<8x96xf32>
    %144 = math.exp %143 : vector<8x96xf32>
    %cst_46 = arith.constant 1.000000e+00 : f32
    %145 = vector.broadcast %cst_46 : f32 to vector<8x96xf32>
    %146 = arith.addf %145, %144 : vector<8x96xf32>
    %147 = arith.divf %145, %146 : vector<8x96xf32>
    %148 = vector.extract_strided_slice %147 {offsets = [0, 0], sizes = [8, 32], strides = [1, 1]} : vector<8x96xf32> to vector<8x32xf32>
    %149 = vector.extract_strided_slice %147 {offsets = [0, 32], sizes = [8, 32], strides = [1, 1]} : vector<8x96xf32> to vector<8x32xf32>
    %150 = vector.extract_strided_slice %147 {offsets = [0, 64], sizes = [8, 32], strides = [1, 1]} : vector<8x96xf32> to vector<8x32xf32>
    %151 = vector.extract_strided_slice %141 {offsets = [0, 96], sizes = [8, 32], strides = [1, 1]} : vector<8x128xf32> to vector<8x32xf32>
    %152 = math.tanh %151 : vector<8x32xf32>
    %153 = arith.mulf %149, %130 : vector<8x32xf32>
    %154 = arith.mulf %148, %152 : vector<8x32xf32>
    %155 = arith.addf %153, %154 : vector<8x32xf32>
    %156 = math.tanh %155 : vector<8x32xf32>
    %157 = arith.mulf %150, %156 : vector<8x32xf32>
    %158 = arith.index_cast %c5_i32 : i32 to index
    %c0_47 = arith.constant 0 : index
    %c0_48 = arith.constant 0 : index
    %159 = vector.load %arg11[%158, %c0_47, %c0_48] : memref<8x8x32xf32, #tpu.memory_space<vmem>>, vector<1x8x32xf32>
    %160 = vector.shape_cast %159 : vector<1x8x32xf32> to vector<8x32xf32>
    %161 = vector.shape_cast %157 : vector<8x32xf32> to vector<1x8x32xf32>
    tpu.vector_store %arg11[%158, %c0_47, %c0_48], %161 {strides = array<i32>} : memref<8x8x32xf32, #tpu.memory_space<vmem>>, vector<1x8x32xf32>,
    %c6_i32 = arith.constant 6 : i32
    %162 = arith.index_cast %c6_i32 : i32 to index
    %c0_49 = arith.constant 0 : index
    %c0_50 = arith.constant 0 : index
    %163 = vector.load %arg10[%162, %c0_49, %c0_50] : memref<8x8x128xf32, #tpu.memory_space<vmem>>, vector<1x8x128xf32>
    %164 = vector.shape_cast %163 : vector<1x8x128xf32> to vector<8x128xf32>
    %cst_51 = arith.constant dense<0.000000e+00> : vector<8x128xf32>
    %165 = tpu.matmul %157, %1, %cst_51 {dimension_numbers = #tpu.dot_dimension_numbers<[1], [0], [0], [1], [0, 0, 1, 1], [], []>} : vector<8x32xf32>, vector<32x128xf32>, vector<8x128xf32> -> vector<8x128xf32>
    %166 = arith.addf %164, %165 : vector<8x128xf32>
    %167 = vector.extract_strided_slice %166 {offsets = [0, 0], sizes = [8, 96], strides = [1, 1]} : vector<8x128xf32> to vector<8x96xf32>
    %168 = arith.negf %167 : vector<8x96xf32>
    %169 = math.exp %168 : vector<8x96xf32>
    %cst_52 = arith.constant 1.000000e+00 : f32
    %170 = vector.broadcast %cst_52 : f32 to vector<8x96xf32>
    %171 = arith.addf %170, %169 : vector<8x96xf32>
    %172 = arith.divf %170, %171 : vector<8x96xf32>
    %173 = vector.extract_strided_slice %172 {offsets = [0, 0], sizes = [8, 32], strides = [1, 1]} : vector<8x96xf32> to vector<8x32xf32>
    %174 = vector.extract_strided_slice %172 {offsets = [0, 32], sizes = [8, 32], strides = [1, 1]} : vector<8x96xf32> to vector<8x32xf32>
    %175 = vector.extract_strided_slice %172 {offsets = [0, 64], sizes = [8, 32], strides = [1, 1]} : vector<8x96xf32> to vector<8x32xf32>
    %176 = vector.extract_strided_slice %166 {offsets = [0, 96], sizes = [8, 32], strides = [1, 1]} : vector<8x128xf32> to vector<8x32xf32>
    %177 = math.tanh %176 : vector<8x32xf32>
    %178 = arith.mulf %174, %155 : vector<8x32xf32>
    %179 = arith.mulf %173, %177 : vector<8x32xf32>
    %180 = arith.addf %178, %179 : vector<8x32xf32>
    %181 = math.tanh %180 : vector<8x32xf32>
    %182 = arith.mulf %175, %181 : vector<8x32xf32>
    %183 = arith.index_cast %c6_i32 : i32 to index
    %c0_53 = arith.constant 0 : index
    %c0_54 = arith.constant 0 : index
    %184 = vector.load %arg11[%183, %c0_53, %c0_54] : memref<8x8x32xf32, #tpu.memory_space<vmem>>, vector<1x8x32xf32>
    %185 = vector.shape_cast %184 : vector<1x8x32xf32> to vector<8x32xf32>
    %186 = vector.shape_cast %182 : vector<8x32xf32> to vector<1x8x32xf32>
    tpu.vector_store %arg11[%183, %c0_53, %c0_54], %186 {strides = array<i32>} : memref<8x8x32xf32, #tpu.memory_space<vmem>>, vector<1x8x32xf32>,
    %c7_i32 = arith.constant 7 : i32
    %187 = arith.index_cast %c7_i32 : i32 to index
    %c0_55 = arith.constant 0 : index
    %c0_56 = arith.constant 0 : index
    %188 = vector.load %arg10[%187, %c0_55, %c0_56] : memref<8x8x128xf32, #tpu.memory_space<vmem>>, vector<1x8x128xf32>
    %189 = vector.shape_cast %188 : vector<1x8x128xf32> to vector<8x128xf32>
    %cst_57 = arith.constant dense<0.000000e+00> : vector<8x128xf32>
    %190 = tpu.matmul %182, %1, %cst_57 {dimension_numbers = #tpu.dot_dimension_numbers<[1], [0], [0], [1], [0, 0, 1, 1], [], []>} : vector<8x32xf32>, vector<32x128xf32>, vector<8x128xf32> -> vector<8x128xf32>
    %191 = arith.addf %189, %190 : vector<8x128xf32>
    %192 = vector.extract_strided_slice %191 {offsets = [0, 0], sizes = [8, 96], strides = [1, 1]} : vector<8x128xf32> to vector<8x96xf32>
    %193 = arith.negf %192 : vector<8x96xf32>
    %194 = math.exp %193 : vector<8x96xf32>
    %cst_58 = arith.constant 1.000000e+00 : f32
    %195 = vector.broadcast %cst_58 : f32 to vector<8x96xf32>
    %196 = arith.addf %195, %194 : vector<8x96xf32>
    %197 = arith.divf %195, %196 : vector<8x96xf32>
    %198 = vector.extract_strided_slice %197 {offsets = [0, 0], sizes = [8, 32], strides = [1, 1]} : vector<8x96xf32> to vector<8x32xf32>
    %199 = vector.extract_strided_slice %197 {offsets = [0, 32], sizes = [8, 32], strides = [1, 1]} : vector<8x96xf32> to vector<8x32xf32>
    %200 = vector.extract_strided_slice %197 {offsets = [0, 64], sizes = [8, 32], strides = [1, 1]} : vector<8x96xf32> to vector<8x32xf32>
    %201 = vector.extract_strided_slice %191 {offsets = [0, 96], sizes = [8, 32], strides = [1, 1]} : vector<8x128xf32> to vector<8x32xf32>
    %202 = math.tanh %201 : vector<8x32xf32>
    %203 = arith.mulf %199, %180 : vector<8x32xf32>
    %204 = arith.mulf %198, %202 : vector<8x32xf32>
    %205 = arith.addf %203, %204 : vector<8x32xf32>
    %206 = math.tanh %205 : vector<8x32xf32>
    %207 = arith.mulf %200, %206 : vector<8x32xf32>
    %208 = arith.index_cast %c7_i32 : i32 to index
    %c0_59 = arith.constant 0 : index
    %c0_60 = arith.constant 0 : index
    %209 = vector.load %arg11[%208, %c0_59, %c0_60] : memref<8x8x32xf32, #tpu.memory_space<vmem>>, vector<1x8x32xf32>
    %210 = vector.shape_cast %209 : vector<1x8x32xf32> to vector<8x32xf32>
    %211 = vector.shape_cast %207 : vector<8x32xf32> to vector<1x8x32xf32>
    tpu.vector_store %arg11[%208, %c0_59, %c0_60], %211 {strides = array<i32>} : memref<8x8x32xf32, #tpu.memory_space<vmem>>, vector<1x8x32xf32>,
    %c8_i32 = arith.constant 8 : i32
    %c0_61 = arith.constant 0 : index
    %c0_62 = arith.constant 0 : index
    %212 = vector.load %arg4[%c0_61, %c0_62] : memref<32x128xf32, #tpu.memory_space<vmem>>, vector<32x128xf32>
    %c0_63 = arith.constant 0 : index
    %c0_64 = arith.constant 0 : index
    %213 = vector.load %arg5[%c0_63, %c0_64] : memref<32x128xf32, #tpu.memory_space<vmem>>, vector<32x128xf32>
    %c0_65 = arith.constant 0 : index
    %c0_66 = arith.constant 0 : index
    %214 = vector.load %arg6[%c0_65, %c0_66] : memref<1x128xf32, #tpu.memory_space<vmem>>, vector<1x128xf32>
    %c0_67 = arith.constant 0 : index
    %c0_68 = arith.constant 0 : index
    %c0_69 = arith.constant 0 : index
    %215 = vector.load %arg11[%c0_67, %c0_68, %c0_69] : memref<8x8x32xf32, #tpu.memory_space<vmem>>, vector<8x8x32xf32>
    %216 = vector.shape_cast %215 : vector<8x8x32xf32> to vector<64x32xf32>
    %cst_70 = arith.constant dense<0.000000e+00> : vector<64x128xf32>
    %217 = tpu.matmul %216, %212, %cst_70 {dimension_numbers = #tpu.dot_dimension_numbers<[1], [0], [0], [1], [0, 0, 1, 1], [], []>} : vector<64x32xf32>, vector<32x128xf32>, vector<64x128xf32> -> vector<64x128xf32>
    %218 = vector.broadcast %214 : vector<1x128xf32> to vector<64x128xf32>
    %219 = arith.addf %217, %218 : vector<64x128xf32>
    %220 = vector.shape_cast %219 : vector<64x128xf32> to vector<8x8x128xf32>
    %c0_71 = arith.constant 0 : index
    %c0_72 = arith.constant 0 : index
    %c0_73 = arith.constant 0 : index
    %221 = vector.load %arg10[%c0_71, %c0_72, %c0_73] : memref<8x8x128xf32, #tpu.memory_space<vmem>>, vector<8x8x128xf32>
    tpu.vector_store %arg10[%c0_71, %c0_72, %c0_73], %220 {strides = array<i32>} : memref<8x8x128xf32, #tpu.memory_space<vmem>>, vector<8x8x128xf32>,
    %cst_74 = arith.constant 0.000000e+00 : f32
    %222 = vector.broadcast %cst_74 : f32 to vector<8x32xf32>
    %cst_75 = arith.constant 0.000000e+00 : f32
    %223 = vector.broadcast %cst_75 : f32 to vector<8x32xf32>
    %c0_i32_76 = arith.constant 0 : i32
    %224 = arith.index_cast %c0_i32_76 : i32 to index
    %c0_77 = arith.constant 0 : index
    %c0_78 = arith.constant 0 : index
    %225 = vector.load %arg10[%224, %c0_77, %c0_78] : memref<8x8x128xf32, #tpu.memory_space<vmem>>, vector<1x8x128xf32>
    %226 = vector.shape_cast %225 : vector<1x8x128xf32> to vector<8x128xf32>
    %cst_79 = arith.constant dense<0.000000e+00> : vector<8x128xf32>
    %227 = tpu.matmul %222, %213, %cst_79 {dimension_numbers = #tpu.dot_dimension_numbers<[1], [0], [0], [1], [0, 0, 1, 1], [], []>} : vector<8x32xf32>, vector<32x128xf32>, vector<8x128xf32> -> vector<8x128xf32>
    %228 = arith.addf %226, %227 : vector<8x128xf32>
    %229 = vector.extract_strided_slice %228 {offsets = [0, 0], sizes = [8, 96], strides = [1, 1]} : vector<8x128xf32> to vector<8x96xf32>
    %230 = arith.negf %229 : vector<8x96xf32>
    %231 = math.exp %230 : vector<8x96xf32>
    %cst_80 = arith.constant 1.000000e+00 : f32
    %232 = vector.broadcast %cst_80 : f32 to vector<8x96xf32>
    %233 = arith.addf %232, %231 : vector<8x96xf32>
    %234 = arith.divf %232, %233 : vector<8x96xf32>
    %235 = vector.extract_strided_slice %234 {offsets = [0, 0], sizes = [8, 32], strides = [1, 1]} : vector<8x96xf32> to vector<8x32xf32>
    %236 = vector.extract_strided_slice %234 {offsets = [0, 32], sizes = [8, 32], strides = [1, 1]} : vector<8x96xf32> to vector<8x32xf32>
    %237 = vector.extract_strided_slice %234 {offsets = [0, 64], sizes = [8, 32], strides = [1, 1]} : vector<8x96xf32> to vector<8x32xf32>
    %238 = vector.extract_strided_slice %228 {offsets = [0, 96], sizes = [8, 32], strides = [1, 1]} : vector<8x128xf32> to vector<8x32xf32>
    %239 = math.tanh %238 : vector<8x32xf32>
    %240 = arith.mulf %236, %223 : vector<8x32xf32>
    %241 = arith.mulf %235, %239 : vector<8x32xf32>
    %242 = arith.addf %240, %241 : vector<8x32xf32>
    %243 = math.tanh %242 : vector<8x32xf32>
    %244 = arith.mulf %237, %243 : vector<8x32xf32>
    %c1_i32_81 = arith.constant 1 : i32
    %245 = arith.index_cast %c1_i32_81 : i32 to index
    %c0_82 = arith.constant 0 : index
    %c0_83 = arith.constant 0 : index
    %246 = vector.load %arg10[%245, %c0_82, %c0_83] : memref<8x8x128xf32, #tpu.memory_space<vmem>>, vector<1x8x128xf32>
    %247 = vector.shape_cast %246 : vector<1x8x128xf32> to vector<8x128xf32>
    %cst_84 = arith.constant dense<0.000000e+00> : vector<8x128xf32>
    %248 = tpu.matmul %244, %213, %cst_84 {dimension_numbers = #tpu.dot_dimension_numbers<[1], [0], [0], [1], [0, 0, 1, 1], [], []>} : vector<8x32xf32>, vector<32x128xf32>, vector<8x128xf32> -> vector<8x128xf32>
    %249 = arith.addf %247, %248 : vector<8x128xf32>
    %250 = vector.extract_strided_slice %249 {offsets = [0, 0], sizes = [8, 96], strides = [1, 1]} : vector<8x128xf32> to vector<8x96xf32>
    %251 = arith.negf %250 : vector<8x96xf32>
    %252 = math.exp %251 : vector<8x96xf32>
    %cst_85 = arith.constant 1.000000e+00 : f32
    %253 = vector.broadcast %cst_85 : f32 to vector<8x96xf32>
    %254 = arith.addf %253, %252 : vector<8x96xf32>
    %255 = arith.divf %253, %254 : vector<8x96xf32>
    %256 = vector.extract_strided_slice %255 {offsets = [0, 0], sizes = [8, 32], strides = [1, 1]} : vector<8x96xf32> to vector<8x32xf32>
    %257 = vector.extract_strided_slice %255 {offsets = [0, 32], sizes = [8, 32], strides = [1, 1]} : vector<8x96xf32> to vector<8x32xf32>
    %258 = vector.extract_strided_slice %255 {offsets = [0, 64], sizes = [8, 32], strides = [1, 1]} : vector<8x96xf32> to vector<8x32xf32>
    %259 = vector.extract_strided_slice %249 {offsets = [0, 96], sizes = [8, 32], strides = [1, 1]} : vector<8x128xf32> to vector<8x32xf32>
    %260 = math.tanh %259 : vector<8x32xf32>
    %261 = arith.mulf %257, %242 : vector<8x32xf32>
    %262 = arith.mulf %256, %260 : vector<8x32xf32>
    %263 = arith.addf %261, %262 : vector<8x32xf32>
    %264 = math.tanh %263 : vector<8x32xf32>
    %265 = arith.mulf %258, %264 : vector<8x32xf32>
    %c2_i32_86 = arith.constant 2 : i32
    %266 = arith.index_cast %c2_i32_86 : i32 to index
    %c0_87 = arith.constant 0 : index
    %c0_88 = arith.constant 0 : index
    %267 = vector.load %arg10[%266, %c0_87, %c0_88] : memref<8x8x128xf32, #tpu.memory_space<vmem>>, vector<1x8x128xf32>
    %268 = vector.shape_cast %267 : vector<1x8x128xf32> to vector<8x128xf32>
    %cst_89 = arith.constant dense<0.000000e+00> : vector<8x128xf32>
    %269 = tpu.matmul %265, %213, %cst_89 {dimension_numbers = #tpu.dot_dimension_numbers<[1], [0], [0], [1], [0, 0, 1, 1], [], []>} : vector<8x32xf32>, vector<32x128xf32>, vector<8x128xf32> -> vector<8x128xf32>
    %270 = arith.addf %268, %269 : vector<8x128xf32>
    %271 = vector.extract_strided_slice %270 {offsets = [0, 0], sizes = [8, 96], strides = [1, 1]} : vector<8x128xf32> to vector<8x96xf32>
    %272 = arith.negf %271 : vector<8x96xf32>
    %273 = math.exp %272 : vector<8x96xf32>
    %cst_90 = arith.constant 1.000000e+00 : f32
    %274 = vector.broadcast %cst_90 : f32 to vector<8x96xf32>
    %275 = arith.addf %274, %273 : vector<8x96xf32>
    %276 = arith.divf %274, %275 : vector<8x96xf32>
    %277 = vector.extract_strided_slice %276 {offsets = [0, 0], sizes = [8, 32], strides = [1, 1]} : vector<8x96xf32> to vector<8x32xf32>
    %278 = vector.extract_strided_slice %276 {offsets = [0, 32], sizes = [8, 32], strides = [1, 1]} : vector<8x96xf32> to vector<8x32xf32>
    %279 = vector.extract_strided_slice %276 {offsets = [0, 64], sizes = [8, 32], strides = [1, 1]} : vector<8x96xf32> to vector<8x32xf32>
    %280 = vector.extract_strided_slice %270 {offsets = [0, 96], sizes = [8, 32], strides = [1, 1]} : vector<8x128xf32> to vector<8x32xf32>
    %281 = math.tanh %280 : vector<8x32xf32>
    %282 = arith.mulf %278, %263 : vector<8x32xf32>
    %283 = arith.mulf %277, %281 : vector<8x32xf32>
    %284 = arith.addf %282, %283 : vector<8x32xf32>
    %285 = math.tanh %284 : vector<8x32xf32>
    %286 = arith.mulf %279, %285 : vector<8x32xf32>
    %c3_i32_91 = arith.constant 3 : i32
    %287 = arith.index_cast %c3_i32_91 : i32 to index
    %c0_92 = arith.constant 0 : index
    %c0_93 = arith.constant 0 : index
    %288 = vector.load %arg10[%287, %c0_92, %c0_93] : memref<8x8x128xf32, #tpu.memory_space<vmem>>, vector<1x8x128xf32>
    %289 = vector.shape_cast %288 : vector<1x8x128xf32> to vector<8x128xf32>
    %cst_94 = arith.constant dense<0.000000e+00> : vector<8x128xf32>
    %290 = tpu.matmul %286, %213, %cst_94 {dimension_numbers = #tpu.dot_dimension_numbers<[1], [0], [0], [1], [0, 0, 1, 1], [], []>} : vector<8x32xf32>, vector<32x128xf32>, vector<8x128xf32> -> vector<8x128xf32>
    %291 = arith.addf %289, %290 : vector<8x128xf32>
    %292 = vector.extract_strided_slice %291 {offsets = [0, 0], sizes = [8, 96], strides = [1, 1]} : vector<8x128xf32> to vector<8x96xf32>
    %293 = arith.negf %292 : vector<8x96xf32>
    %294 = math.exp %293 : vector<8x96xf32>
    %cst_95 = arith.constant 1.000000e+00 : f32
    %295 = vector.broadcast %cst_95 : f32 to vector<8x96xf32>
    %296 = arith.addf %295, %294 : vector<8x96xf32>
    %297 = arith.divf %295, %296 : vector<8x96xf32>
    %298 = vector.extract_strided_slice %297 {offsets = [0, 0], sizes = [8, 32], strides = [1, 1]} : vector<8x96xf32> to vector<8x32xf32>
    %299 = vector.extract_strided_slice %297 {offsets = [0, 32], sizes = [8, 32], strides = [1, 1]} : vector<8x96xf32> to vector<8x32xf32>
    %300 = vector.extract_strided_slice %297 {offsets = [0, 64], sizes = [8, 32], strides = [1, 1]} : vector<8x96xf32> to vector<8x32xf32>
    %301 = vector.extract_strided_slice %291 {offsets = [0, 96], sizes = [8, 32], strides = [1, 1]} : vector<8x128xf32> to vector<8x32xf32>
    %302 = math.tanh %301 : vector<8x32xf32>
    %303 = arith.mulf %299, %284 : vector<8x32xf32>
    %304 = arith.mulf %298, %302 : vector<8x32xf32>
    %305 = arith.addf %303, %304 : vector<8x32xf32>
    %306 = math.tanh %305 : vector<8x32xf32>
    %307 = arith.mulf %300, %306 : vector<8x32xf32>
    %c4_i32_96 = arith.constant 4 : i32
    %308 = arith.index_cast %c4_i32_96 : i32 to index
    %c0_97 = arith.constant 0 : index
    %c0_98 = arith.constant 0 : index
    %309 = vector.load %arg10[%308, %c0_97, %c0_98] : memref<8x8x128xf32, #tpu.memory_space<vmem>>, vector<1x8x128xf32>
    %310 = vector.shape_cast %309 : vector<1x8x128xf32> to vector<8x128xf32>
    %cst_99 = arith.constant dense<0.000000e+00> : vector<8x128xf32>
    %311 = tpu.matmul %307, %213, %cst_99 {dimension_numbers = #tpu.dot_dimension_numbers<[1], [0], [0], [1], [0, 0, 1, 1], [], []>} : vector<8x32xf32>, vector<32x128xf32>, vector<8x128xf32> -> vector<8x128xf32>
    %312 = arith.addf %310, %311 : vector<8x128xf32>
    %313 = vector.extract_strided_slice %312 {offsets = [0, 0], sizes = [8, 96], strides = [1, 1]} : vector<8x128xf32> to vector<8x96xf32>
    %314 = arith.negf %313 : vector<8x96xf32>
    %315 = math.exp %314 : vector<8x96xf32>
    %cst_100 = arith.constant 1.000000e+00 : f32
    %316 = vector.broadcast %cst_100 : f32 to vector<8x96xf32>
    %317 = arith.addf %316, %315 : vector<8x96xf32>
    %318 = arith.divf %316, %317 : vector<8x96xf32>
    %319 = vector.extract_strided_slice %318 {offsets = [0, 0], sizes = [8, 32], strides = [1, 1]} : vector<8x96xf32> to vector<8x32xf32>
    %320 = vector.extract_strided_slice %318 {offsets = [0, 32], sizes = [8, 32], strides = [1, 1]} : vector<8x96xf32> to vector<8x32xf32>
    %321 = vector.extract_strided_slice %318 {offsets = [0, 64], sizes = [8, 32], strides = [1, 1]} : vector<8x96xf32> to vector<8x32xf32>
    %322 = vector.extract_strided_slice %312 {offsets = [0, 96], sizes = [8, 32], strides = [1, 1]} : vector<8x128xf32> to vector<8x32xf32>
    %323 = math.tanh %322 : vector<8x32xf32>
    %324 = arith.mulf %320, %305 : vector<8x32xf32>
    %325 = arith.mulf %319, %323 : vector<8x32xf32>
    %326 = arith.addf %324, %325 : vector<8x32xf32>
    %327 = math.tanh %326 : vector<8x32xf32>
    %328 = arith.mulf %321, %327 : vector<8x32xf32>
    %c5_i32_101 = arith.constant 5 : i32
    %329 = arith.index_cast %c5_i32_101 : i32 to index
    %c0_102 = arith.constant 0 : index
    %c0_103 = arith.constant 0 : index
    %330 = vector.load %arg10[%329, %c0_102, %c0_103] : memref<8x8x128xf32, #tpu.memory_space<vmem>>, vector<1x8x128xf32>
    %331 = vector.shape_cast %330 : vector<1x8x128xf32> to vector<8x128xf32>
    %cst_104 = arith.constant dense<0.000000e+00> : vector<8x128xf32>
    %332 = tpu.matmul %328, %213, %cst_104 {dimension_numbers = #tpu.dot_dimension_numbers<[1], [0], [0], [1], [0, 0, 1, 1], [], []>} : vector<8x32xf32>, vector<32x128xf32>, vector<8x128xf32> -> vector<8x128xf32>
    %333 = arith.addf %331, %332 : vector<8x128xf32>
    %334 = vector.extract_strided_slice %333 {offsets = [0, 0], sizes = [8, 96], strides = [1, 1]} : vector<8x128xf32> to vector<8x96xf32>
    %335 = arith.negf %334 : vector<8x96xf32>
    %336 = math.exp %335 : vector<8x96xf32>
    %cst_105 = arith.constant 1.000000e+00 : f32
    %337 = vector.broadcast %cst_105 : f32 to vector<8x96xf32>
    %338 = arith.addf %337, %336 : vector<8x96xf32>
    %339 = arith.divf %337, %338 : vector<8x96xf32>
    %340 = vector.extract_strided_slice %339 {offsets = [0, 0], sizes = [8, 32], strides = [1, 1]} : vector<8x96xf32> to vector<8x32xf32>
    %341 = vector.extract_strided_slice %339 {offsets = [0, 32], sizes = [8, 32], strides = [1, 1]} : vector<8x96xf32> to vector<8x32xf32>
    %342 = vector.extract_strided_slice %339 {offsets = [0, 64], sizes = [8, 32], strides = [1, 1]} : vector<8x96xf32> to vector<8x32xf32>
    %343 = vector.extract_strided_slice %333 {offsets = [0, 96], sizes = [8, 32], strides = [1, 1]} : vector<8x128xf32> to vector<8x32xf32>
    %344 = math.tanh %343 : vector<8x32xf32>
    %345 = arith.mulf %341, %326 : vector<8x32xf32>
    %346 = arith.mulf %340, %344 : vector<8x32xf32>
    %347 = arith.addf %345, %346 : vector<8x32xf32>
    %348 = math.tanh %347 : vector<8x32xf32>
    %349 = arith.mulf %342, %348 : vector<8x32xf32>
    %c6_i32_106 = arith.constant 6 : i32
    %350 = arith.index_cast %c6_i32_106 : i32 to index
    %c0_107 = arith.constant 0 : index
    %c0_108 = arith.constant 0 : index
    %351 = vector.load %arg10[%350, %c0_107, %c0_108] : memref<8x8x128xf32, #tpu.memory_space<vmem>>, vector<1x8x128xf32>
    %352 = vector.shape_cast %351 : vector<1x8x128xf32> to vector<8x128xf32>
    %cst_109 = arith.constant dense<0.000000e+00> : vector<8x128xf32>
    %353 = tpu.matmul %349, %213, %cst_109 {dimension_numbers = #tpu.dot_dimension_numbers<[1], [0], [0], [1], [0, 0, 1, 1], [], []>} : vector<8x32xf32>, vector<32x128xf32>, vector<8x128xf32> -> vector<8x128xf32>
    %354 = arith.addf %352, %353 : vector<8x128xf32>
    %355 = vector.extract_strided_slice %354 {offsets = [0, 0], sizes = [8, 96], strides = [1, 1]} : vector<8x128xf32> to vector<8x96xf32>
    %356 = arith.negf %355 : vector<8x96xf32>
    %357 = math.exp %356 : vector<8x96xf32>
    %cst_110 = arith.constant 1.000000e+00 : f32
    %358 = vector.broadcast %cst_110 : f32 to vector<8x96xf32>
    %359 = arith.addf %358, %357 : vector<8x96xf32>
    %360 = arith.divf %358, %359 : vector<8x96xf32>
    %361 = vector.extract_strided_slice %360 {offsets = [0, 0], sizes = [8, 32], strides = [1, 1]} : vector<8x96xf32> to vector<8x32xf32>
    %362 = vector.extract_strided_slice %360 {offsets = [0, 32], sizes = [8, 32], strides = [1, 1]} : vector<8x96xf32> to vector<8x32xf32>
    %363 = vector.extract_strided_slice %360 {offsets = [0, 64], sizes = [8, 32], strides = [1, 1]} : vector<8x96xf32> to vector<8x32xf32>
    %364 = vector.extract_strided_slice %354 {offsets = [0, 96], sizes = [8, 32], strides = [1, 1]} : vector<8x128xf32> to vector<8x32xf32>
    %365 = math.tanh %364 : vector<8x32xf32>
    %366 = arith.mulf %362, %347 : vector<8x32xf32>
    %367 = arith.mulf %361, %365 : vector<8x32xf32>
    %368 = arith.addf %366, %367 : vector<8x32xf32>
    %369 = math.tanh %368 : vector<8x32xf32>
    %370 = arith.mulf %363, %369 : vector<8x32xf32>
    %c7_i32_111 = arith.constant 7 : i32
    %371 = arith.index_cast %c7_i32_111 : i32 to index
    %c0_112 = arith.constant 0 : index
    %c0_113 = arith.constant 0 : index
    %372 = vector.load %arg10[%371, %c0_112, %c0_113] : memref<8x8x128xf32, #tpu.memory_space<vmem>>, vector<1x8x128xf32>
    %373 = vector.shape_cast %372 : vector<1x8x128xf32> to vector<8x128xf32>
    %cst_114 = arith.constant dense<0.000000e+00> : vector<8x128xf32>
    %374 = tpu.matmul %370, %213, %cst_114 {dimension_numbers = #tpu.dot_dimension_numbers<[1], [0], [0], [1], [0, 0, 1, 1], [], []>} : vector<8x32xf32>, vector<32x128xf32>, vector<8x128xf32> -> vector<8x128xf32>
    %375 = arith.addf %373, %374 : vector<8x128xf32>
    %376 = vector.extract_strided_slice %375 {offsets = [0, 0], sizes = [8, 96], strides = [1, 1]} : vector<8x128xf32> to vector<8x96xf32>
    %377 = arith.negf %376 : vector<8x96xf32>
    %378 = math.exp %377 : vector<8x96xf32>
    %cst_115 = arith.constant 1.000000e+00 : f32
    %379 = vector.broadcast %cst_115 : f32 to vector<8x96xf32>
    %380 = arith.addf %379, %378 : vector<8x96xf32>
    %381 = arith.divf %379, %380 : vector<8x96xf32>
    %382 = vector.extract_strided_slice %381 {offsets = [0, 0], sizes = [8, 32], strides = [1, 1]} : vector<8x96xf32> to vector<8x32xf32>
    %383 = vector.extract_strided_slice %381 {offsets = [0, 32], sizes = [8, 32], strides = [1, 1]} : vector<8x96xf32> to vector<8x32xf32>
    %384 = vector.extract_strided_slice %381 {offsets = [0, 64], sizes = [8, 32], strides = [1, 1]} : vector<8x96xf32> to vector<8x32xf32>
    %385 = vector.extract_strided_slice %375 {offsets = [0, 96], sizes = [8, 32], strides = [1, 1]} : vector<8x128xf32> to vector<8x32xf32>
    %386 = math.tanh %385 : vector<8x32xf32>
    %387 = arith.mulf %383, %368 : vector<8x32xf32>
    %388 = arith.mulf %382, %386 : vector<8x32xf32>
    %389 = arith.addf %387, %388 : vector<8x32xf32>
    %390 = math.tanh %389 : vector<8x32xf32>
    %391 = arith.mulf %384, %390 : vector<8x32xf32>
    %c8_i32_116 = arith.constant 8 : i32
    %c0_117 = arith.constant 0 : index
    %c0_118 = arith.constant 0 : index
    %392 = vector.load %arg7[%c0_117, %c0_118] : memref<32x128xf32, #tpu.memory_space<vmem>>, vector<32x128xf32>
    %cst_119 = arith.constant dense<0.000000e+00> : vector<8x128xf32>
    %393 = tpu.matmul %391, %392, %cst_119 {dimension_numbers = #tpu.dot_dimension_numbers<[1], [0], [0], [1], [0, 0, 1, 1], [], []>} : vector<8x32xf32>, vector<32x128xf32>, vector<8x128xf32> -> vector<8x128xf32>
    %c0_120 = arith.constant 0 : index
    %c0_121 = arith.constant 0 : index
    %394 = vector.load %arg8[%c0_120, %c0_121] : memref<1x128xf32, #tpu.memory_space<vmem>>, vector<1x128xf32>
    %395 = vector.broadcast %394 : vector<1x128xf32> to vector<8x128xf32>
    %396 = arith.addf %393, %395 : vector<8x128xf32>
    %c0_122 = arith.constant 0 : index
    %c0_123 = arith.constant 0 : index
    %397 = vector.load %arg9[%c0_122, %c0_123] : memref<8x128xf32, #tpu.memory_space<vmem>>, vector<8x128xf32>
    tpu.vector_store %arg9[%c0_122, %c0_123], %396 {strides = array<i32>} : memref<8x128xf32, #tpu.memory_space<vmem>>, vector<8x128xf32>,
    return
  }
}

</mosaic_0001>

<bundles_post_ra>
// kernel: lstm_classifier_forward.1
= control target key start
LH: loop header
LB: loop body
LE: loop exit
PB: predicated region body
PF: predicated region fallthrough
CT: control target
= control target key end

     0   :  { %14 = vsyncpa [#allocation5], 0  ;;  %s1942_s0 = inlined_call_operand.vmem [shape: f32[8,8,16], index: 0, kind: input, shape index: {}]   ;;  %s1943_s1 = inlined_call_operand.vmem [shape: f32[16,128], index: 1, kind: input, shape index: {}]   ;;  %s1944_s2 = inlined_call_operand.vmem [shape: f32[32,128], index: 2, kind: input, shape index: {}]   ;;  %s1945_s3 = inlined_call_operand.vmem [shape: f32[1,128], index: 3, kind: input, shape index: {}]   ;;  %s1946_s4 = inlined_call_operand.vmem [shape: f32[32,128], index: 4, kind: input, shape index: {}]   ;;  %s1947_s5 = inlined_call_operand.vmem [shape: f32[32,128], index: 5, kind: input, shape index: {}]   ;;  %s1948_s6 = inlined_call_operand.vmem [shape: f32[1,128], index: 6, kind: input, shape index: {}]   ;;  %s1949_s7 = inlined_call_operand.hbm [shape: f32[32,128], index: 7, kind: input, shape index: {}]   ;;  %s1950_s8 = inlined_call_operand.hbm [shape: f32[1,128], index: 8, kind: input, shape index: {}]   ;;  %s1951_s9 = inlined_call_operand.vmem [shape: f32[8,128], index: 9, kind: output, shape index: {}]  }
   0x1   :  { %s34_s11 = sshll.u32 %s1949_s7, 4  ;;  %s35_s11 = int_to_ptr.hbm [resolvable:$true] %s34_s11 }
   0x2   :  { %15 = vsyncpa [#allocation7], 0  ;;  %s1576_s12 = smov [#allocation4]   ;;  %s48_s16 = sshll.u32 %s1950_s8, 4  ;;  %s49_s16 = int_to_ptr.hbm [resolvable:$true] %s48_s16 }
   0x3   :  { %s36_s13 = sshll.u32 %s1576_s12, 4  ;;  %s1577_s17 = smov 128   ;;  %s37_s13 = int_to_ptr.vmem [resolvable:$true] %s36_s13 }
   0x4   :  { %s1578_s18 = smov 8   ;;  %s1579_s19 = smov [#allocation6]  }
   0x5   :  { %42 = dma.hbm_to_vmem [thread:$0]  %s35_s11, 512, %s37_s13, [#allocation5], %s1577_s17, %s1577_s17, %s1578_s18  }
   0x6   :  { %s50_s20 = sshll.u32 %s1579_s19, 4  ;;  %s51_s20 = int_to_ptr.vmem [resolvable:$true] %s50_s20 }
   0x7   :  { %53 = dma.hbm_to_vmem [thread:$0]  %s49_s16, 16, %s51_s20, [#allocation7]  }
   0x8   :  { %1572 = dma.done.wait [#allocation5], 512  }
   0x9   :  { %1573 = vsyncadd [#allocation5], 4294966784 }
   0xa   :  { %1574 = dma.done.wait [#allocation7], 16  }
   0xb   :  { %1575 = vsyncadd [#allocation7], 4294967280  ;;  %v1642_v0 = vld [vmem:[%s1944_s2 + $0x18] sm:$0xff]  ;;  %v63_v1 = vld [vmem:[%s1943_s1 + $0x8] sm:$0xff]  ;;  %vm80_vm0 = vcmask 130048   ;;  %v1580_v7 = vmov 0.0  }
   0xc   :  { %v1650_v2 = vld [vmem:[%s1944_s2 + $0x10] sm:$0xff]  ;;  %171 = vmatpush.msra.mxu1 %v1642_v0  ;;  %119 = vmatpush.msra.mxu0 %v63_v1  ;;  %v62_v3 = vld [vmem:[%s1943_s1] sm:$0xff]  ;;  %v1662_v5 = vld [vmem:[%s1944_s2 + $0x8] sm:$0xff]  ;;  %s1581_s12 = smov 32   ;;  %s1582_s13 = smov 64   ;;  %vm155_vm5 = vcmask 261120  }
   0xd   :  { %v69_v4 = vld [vmem:[%s1942_s0] sm:$0xff]  ;;  %238 = vmatpush.msra.mxu2 %v1642_v0  ;;  %v701_v35 = vld [vmem:[%s1946_s4 + $0x18] sm:$0xff]  ;;  %v700_v36 = vld [vmem:[%s1946_s4 + $0x10] sm:$0xff] }
   0xe   :  { %172 = vmatpush.msra.mxu1 %v1650_v2  ;;  %120 = vmatpush.msra.mxu0 %v62_v3  ;;  %v1670_v6 = vld [vmem:[%s1944_s2] sm:$0xff]  ;;  %v70_v37 = vld [vmem:[%s1942_s0 + $0x8] sm:$0xff] }
   0xf   :  { %1338 = vmatmul.msk.f32.vlgmr.msra.gmra.mxu0 %vm80_vm0, %v69_v4  ;;  %239 = vmatpush.msra.mxu2 %v1650_v2  ;;  %v1697_v8 = vld [vmem:[%s1945_s3] ss:$0 sm:$0xff]  ;;  %v699_v38 = vld [vmem:[%s1946_s4 + $0x8] sm:$0xff] }
  0x10   :  { %173 = vmatpush.msra.mxu1 %v1662_v5  ;;  %510 = vmatpush.msrb.mxu0 %v1642_v0  ;;  %v698_v39 = vld [vmem:[%s1946_s4] sm:$0xff] }
  0x11   :  { %240 = vmatpush.msra.mxu2 %v1662_v5  ;;  %754 = vmatpush.msra.mxu3 %v701_v35 }
  0x12   :  { %174 = vmatpush.msra.mxu1 %v1670_v6  ;;  %511 = vmatpush.msrb.mxu0 %v1650_v2 }
  0x13   :  { %175 = vmatmul.f32.vlgmr.msra.gmra.mxu1 %v1580_v7  ;;  %241 = vmatpush.msra.mxu2 %v1670_v6 }
  0x14   :  { %374 = vmatpush.msrb.mxu1 %v1642_v0  ;;  %512 = vmatpush.msrb.mxu0 %v1662_v5 }
  0x15   :  { %306 = vmatpush.msrb.mxu2 %v1642_v0  ;;  %755 = vmatpush.msra.mxu3 %v700_v36 }
  0x16   :  { %375 = vmatpush.msrb.mxu1 %v1650_v2  ;;  %513 = vmatpush.msrb.mxu0 %v1670_v6 }
  0x17   :  { %307 = vmatpush.msrb.mxu2 %v1650_v2  ;;  %1339 = vmatmul.msk.f32.gmra.mxu0 %vm80_vm0, %v70_v37 }
  0x18   :  { %376 = vmatpush.msrb.mxu1 %v1662_v5  ;;  %756 = vmatpush.msra.mxu3 %v699_v38 }
  0x19   :  { %308 = vmatpush.msrb.mxu2 %v1662_v5 }
  0x1a   :  { %377 = vmatpush.msrb.mxu1 %v1670_v6  ;;  %757 = vmatpush.msra.mxu3 %v698_v39 }
  0x1b   :  { %309 = vmatpush.msrb.mxu2 %v1670_v6 }
  0x1c   :  { %578 = vmatpush.msra.mxu1 %v1642_v0 }
  0x1e   :  { %579 = vmatpush.msra.mxu1 %v1650_v2 }
  0x20   :  { %580 = vmatpush.msra.mxu1 %v1662_v5 }
  0x22   :  { %581 = vmatpush.msra.mxu1 %v1670_v6 }
  0x8c   :  { %v122_v9 = vpop.f32.mrf.mxu0 }
  0x8d   :  { %v123_v10 = vadd.f32 %v1697_v8, %v122_v9 }
  0x90   :  { %v176_v11 = vpop.f32.mrf.mxu1 }
  0x91   :  { %v179_v12 = vadd.f32 %v176_v11, %v123_v10  ;;  %v71_v10 = vld [vmem:[%s1942_s0 + $0x10] sm:$0xff] }
  0x92   :  { %1340 = vmatmul.msk.f32.gmra.mxu0 %vm80_vm0, %v71_v10 }
  0x93   :  { %1395 = vtanh.f32 %v179_v12  ;;  %v1346_v14 = vmul.f32 -1.442695, %v179_v12 }
  0x94   :  { %v125_v42 = vpop.f32.mrf.mxu0 }
  0x95   :  { %1397 = vpow2.f32 %v1346_v14  ;;  %v126_v43 = vadd.f32 %v1697_v8, %v125_v42 }
  0x99   :  { %v1396_v13 = vpop.eup %1395 }
  0x9a   :  { %202 = vrot.lane.b32.xlu0 %v1396_v13, %s1581_s12 }
  0x9b   :  { %v1398_v15 = vpop.eup %1397 }
  0x9c   :  { %v183_v16 = vadd.f32 1.0, %v1398_v15 }
  0x9e   :  { %1399 = vrcp.f32 %v183_v16  ;;  %v195_v22 = vand.u32 2147483648, %v183_v16  ;;  %vm189_vm2 = vweird.f32 %v183_v16  ;;  %v193_v23 = vand.u32 2147483647, %v183_v16 }
  0xa0   :  { %v196_v25 = vor.u32 1.1754944e-38, %v195_v22  ;;  %vm194_vm4 = vcmp.eq.f32.partialorder %v193_v23, 8.507059e+37 }
  0xa4   :  { %v1400_v17 = vpop.eup %1399 }
  0xa5   :  { %v185_v18 = vmul.f32 %v1400_v17, %v183_v16  ;;  %vm190_vm1 = vweird.f32 %v1400_v17 }
  0xa6   :  { %vm191_vm3 = vmor %vm189_vm2, %vm190_vm1 }
  0xa7   :  { %v186_v19 = vsub.f32 1.0, %v185_v18 }
  0xa9   :  { %v187_v20 = vmul.f32 %v1400_v17, %v186_v19 }
  0xab   :  { %v188_v21 = vadd.f32 %v1400_v17, %v187_v20 }
  0xad   :  { %v192_v24 = vsel %vm191_vm3, %v1400_v17, %v188_v21 }
  0xae   :  { %v197_v27 = vsel %vm194_vm4, %v196_v25, %v192_v24 }
  0xaf   :  { %v200_v29 = vmul.f32 0.0, %v197_v27 }
 0x10c   :  { %v203_v26 = vpop.permute.xlu0 %202 }
 0x10d   :  { %v205_v28 = vmul.f32 %v203_v26, %v197_v27 }
 0x10f   :  { %207 = vrot.lane.b32.xlu0 %v205_v28, %s1581_s12  ;;  %v128_v13 = vpop.f32.mrf.mxu0 }
 0x110   :  { %v129_v14 = vadd.f32 %v1697_v8, %v128_v13 }
 0x181   :  { %v208_v30 = vpop.permute.xlu0 %207 }
 0x182   :  { %v210_v31 = vadd.f32 %v208_v30, %v200_v29 }
 0x184   :  { %1401 = vtanh.f32 %v210_v31 }
 0x18a   :  { %v1402_v32 = vpop.eup %1401 }
 0x18b   :  { %213 = vrot.lane.b32.xlu1 %v1402_v32, %s1581_s12 }
 0x1fd   :  { %v214_v33 = vpop.permute.xlu1 %213 }
 0x1fe   :  { %v216_v34 = vmul.f32 %v214_v33, %v197_v27  ;;  %v72_v33 = vld [vmem:[%s1942_s0 + $0x18] sm:$0xff] }
 0x1ff   :  { %1341 = vmatmul.msk.f32.gmra.mxu0 %vm80_vm0, %v72_v33 }
 0x200   :  { %218 = vrot.lane.b32.xlu1 %v216_v34, %s1582_s13 }
 0x272   :  { %v219_v40 = vpop.permute.xlu1 %218 }
 0x273   :  { %221 = vst.msk [vmem:[#allocation3] sm:$0xff] %vm155_vm5, %v219_v40  ;;  %1347 = vmatmul.msk.f32.vlgmr.msra.gmra.mxu2 %vm155_vm5, %v219_v40 }
 0x274   :  { %442 = vmatpush.msra.mxu2 %v1642_v0 }
 0x276   :  { %443 = vmatpush.msra.mxu2 %v1650_v2 }
 0x278   :  { %444 = vmatpush.msra.mxu2 %v1662_v5 }
 0x27a   :  { %v707_v41 = vld [vmem:[#allocation3] sm:$0xff]  ;;  %445 = vmatpush.msra.mxu2 %v1670_v6 }
 0x27b   :  { %1361 = vmatmul.msk.f32.vlgmr.msra.gmra.mxu3 %vm155_vm5, %v707_v41 }
 0x27c   :  { %v131_v38 = vpop.f32.mrf.mxu0 }
 0x27d   :  { %v132_v39 = vadd.f32 %v1697_v8, %v131_v38 }
 0x2f6   :  { %v243_v44 = vpop.f32.mrf.mxu2 }
 0x2f7   :  { %v246_v45 = vadd.f32 %v243_v44, %v126_v43 }
 0x2f9   :  { %1403 = vtanh.f32 %v246_v45  ;;  %v1348_v47 = vmul.f32 -1.442695, %v246_v45 }
 0x2fb   :  { %1405 = vpow2.f32 %v1348_v47 }
 0x2ff   :  { %v1404_v46 = vpop.eup %1403 }
 0x300   :  { %269 = vrot.lane.b32.xlu2 %v1404_v46, %s1581_s12 }
 0x301   :  { %v1406_v48 = vpop.eup %1405 }
 0x302   :  { %v250_v49 = vadd.f32 1.0, %v1406_v48 }
 0x304   :  { %1407 = vrcp.f32 %v250_v49  ;;  %v262_v55 = vand.u32 2147483648, %v250_v49  ;;  %vm256_vm7 = vweird.f32 %v250_v49  ;;  %v260_v56 = vand.u32 2147483647, %v250_v49 }
 0x306   :  { %v263_v58 = vor.u32 1.1754944e-38, %v262_v55  ;;  %vm261_vm9 = vcmp.eq.f32.partialorder %v260_v56, 8.507059e+37 }
 0x30a   :  { %v1408_v50 = vpop.eup %1407 }
 0x30b   :  { %v252_v51 = vmul.f32 %v1408_v50, %v250_v49  ;;  %vm257_vm6 = vweird.f32 %v1408_v50 }
 0x30c   :  { %vm258_vm8 = vmor %vm256_vm7, %vm257_vm6 }
 0x30d   :  { %v253_v52 = vsub.f32 1.0, %v252_v51 }
 0x30f   :  { %v254_v53 = vmul.f32 %v1408_v50, %v253_v52 }
 0x311   :  { %v255_v54 = vadd.f32 %v1408_v50, %v254_v53 }
 0x313   :  { %v259_v57 = vsel %vm258_vm8, %v1408_v50, %v255_v54 }
 0x314   :  { %v264_v60 = vsel %vm261_vm9, %v263_v58, %v259_v57 }
 0x315   :  { %v267_v62 = vmul.f32 %v264_v60, %v210_v31 }
 0x35a   :  { %v270_v59 = vpop.permute.xlu2 %269 }
 0x35b   :  { %v272_v61 = vmul.f32 %v270_v59, %v264_v60 }
 0x35d   :  { %274 = vrot.lane.b32.xlu2 %v272_v61, %s1581_s12 }
 0x3b7   :  { %v275_v63 = vpop.permute.xlu2 %274 }
 0x3b8   :  { %v277_v1 = vadd.f32 %v275_v63, %v267_v62 }
 0x3ba   :  { %1409 = vtanh.f32 %v277_v1 }
 0x3c0   :  { %v1410_v3 = vpop.eup %1409 }
 0x3c1   :  { %280 = vrot.lane.b32.xlu0 %v1410_v3, %s1581_s12 }
 0x433   :  { %v281_v4 = vpop.permute.xlu0 %280 }
 0x434   :  { %v283_v9 = vmul.f32 %v281_v4, %v264_v60 }
 0x436   :  { %285 = vrot.lane.b32.xlu1 %v283_v9, %s1582_s13 }
 0x4a8   :  { %v286_v11 = vpop.permute.xlu1 %285 }
 0x4a9   :  { %289 = vst.msk [vmem:[#allocation3 + $0x8] sm:$0xff] %vm155_vm5, %v286_v11  ;;  %1349 = vmatmul.msk.f32.vlgmr.msrb.gmra.mxu2 %vm155_vm5, %v286_v11 }
 0x4aa   :  { %646 = vmatpush.msrb.mxu2 %v1642_v0 }
 0x4ac   :  { %647 = vmatpush.msrb.mxu2 %v1650_v2 }
 0x4ae   :  { %648 = vmatpush.msrb.mxu2 %v1662_v5 }
 0x4b0   :  { %v708_v12 = vld [vmem:[#allocation3 + $0x8] sm:$0xff]  ;;  %649 = vmatpush.msrb.mxu2 %v1670_v6 }
 0x4b1   :  { %1362 = vmatmul.msk.f32.gmra.mxu3 %vm155_vm5, %v708_v12 }
 0x52c   :  { %v311_v15 = vpop.f32.mrf.mxu2 }
 0x52d   :  { %v314_v16 = vadd.f32 %v311_v15, %v129_v14 }
 0x52f   :  { %1411 = vtanh.f32 %v314_v16  ;;  %v1350_v18 = vmul.f32 -1.442695, %v314_v16 }
 0x531   :  { %1413 = vpow2.f32 %v1350_v18 }
 0x535   :  { %v1412_v17 = vpop.eup %1411 }
 0x536   :  { %337 = vrot.lane.b32.xlu2 %v1412_v17, %s1581_s12 }
 0x537   :  { %v1414_v0 = vpop.eup %1413 }
 0x538   :  { %v318_v2 = vadd.f32 1.0, %v1414_v0 }
 0x53a   :  { %1415 = vrcp.f32 %v318_v2  ;;  %v330_v22 = vand.u32 2147483648, %v318_v2  ;;  %vm324_vm11 = vweird.f32 %v318_v2  ;;  %v328_v23 = vand.u32 2147483647, %v318_v2 }
 0x53c   :  { %v331_v25 = vor.u32 1.1754944e-38, %v330_v22  ;;  %vm329_vm13 = vcmp.eq.f32.partialorder %v328_v23, 8.507059e+37 }
 0x540   :  { %v1416_v5 = vpop.eup %1415 }
 0x541   :  { %v320_v19 = vmul.f32 %v1416_v5, %v318_v2  ;;  %vm325_vm10 = vweird.f32 %v1416_v5 }
 0x542   :  { %vm326_vm12 = vmor %vm324_vm11, %vm325_vm10 }
 0x543   :  { %v321_v20 = vsub.f32 1.0, %v320_v19 }
 0x545   :  { %v322_v6 = vmul.f32 %v1416_v5, %v321_v20 }
 0x547   :  { %v323_v21 = vadd.f32 %v1416_v5, %v322_v6 }
 0x549   :  { %v327_v24 = vsel %vm326_vm12, %v1416_v5, %v323_v21 }
 0x54a   :  { %v332_v27 = vsel %vm329_vm13, %v331_v25, %v327_v24 }
 0x54b   :  { %v335_v29 = vmul.f32 %v332_v27, %v277_v1  ;;  %v73_v1 = vld [vmem:[%s1942_s0 + $0x20] sm:$0xff] }
 0x54c   :  { %1342 = vmatmul.msk.f32.gmra.mxu0 %vm80_vm0, %v73_v1  ;;  %v1802_v1 = vld [vmem:[%s1947_s5 + $0x18] sm:$0xff] }
 0x590   :  { %v338_v26 = vpop.permute.xlu2 %337 }
 0x591   :  { %v340_v28 = vmul.f32 %v338_v26, %v332_v27 }
 0x593   :  { %342 = vrot.lane.b32.xlu0 %v340_v28, %s1581_s12 }
 0x5c9   :  { %v134_v9 = vpop.f32.mrf.mxu0 }
 0x5ca   :  { %v135_v10 = vadd.f32 %v1697_v8, %v134_v9  ;;  %v1821_v9 = vld [vmem:[%s1947_s5] sm:$0xff] }
 0x605   :  { %v343_v30 = vpop.permute.xlu0 %342 }
 0x606   :  { %v345_v31 = vadd.f32 %v343_v30, %v335_v29  ;;  %v74_v29 = vld [vmem:[%s1942_s0 + $0x28] sm:$0xff]  ;;  %v75_v30 = vld [vmem:[%s1942_s0 + $0x30] sm:$0xff] }
 0x607   :  { %1343 = vmatmul.msk.f32.gmra.mxu0 %vm80_vm0, %v74_v29 }
 0x608   :  { %1417 = vtanh.f32 %v345_v31 }
 0x60e   :  { %v1418_v32 = vpop.eup %1417 }
 0x60f   :  { %348 = vrot.lane.b32.xlu1 %v1418_v32, %s1581_s12  ;;  %1344 = vmatmul.msk.f32.gmra.mxu0 %vm80_vm0, %v75_v30 }
 0x681   :  { %v349_v34 = vpop.permute.xlu1 %348 }
 0x682   :  { %v351_v35 = vmul.f32 %v349_v34, %v332_v27 }
 0x684   :  { %353 = vrot.lane.b32.xlu2 %v351_v35, %s1582_s13 }
 0x6de   :  { %v354_v36 = vpop.permute.xlu2 %353 }
 0x6df   :  { %357 = vst.msk [vmem:[#allocation3 + $0x10] sm:$0xff] %vm155_vm5, %v354_v36  ;;  %1351 = vmatmul.msk.f32.vlgmr.msrb.gmra.mxu1 %vm155_vm5, %v354_v36  ;;  %v137_v36 = vpop.f32.mrf.mxu0 }
 0x6e0   :  { %804 = vmatpush.msrb.mxu1 %v1802_v1 }
 0x6e6   :  { %v709_v37 = vld [vmem:[#allocation3 + $0x10] sm:$0xff] }
 0x6e7   :  { %1363 = vmatmul.msk.f32.gmra.mxu3 %vm155_vm5, %v709_v37  ;;  %v1787_v37 = vpop.f32.mrf.mxu0 }
 0x75c   :  { %v379_v40 = vpop.f32.mrf.mxu1 }
 0x75d   :  { %v382_v41 = vadd.f32 %v379_v40, %v132_v39  ;;  %v138_v39 = vadd.f32 %v1697_v8, %v137_v36 }
 0x75f   :  { %1419 = vtanh.f32 %v382_v41  ;;  %v1352_v43 = vmul.f32 -1.442695, %v382_v41 }
 0x761   :  { %1421 = vpow2.f32 %v1352_v43 }
 0x765   :  { %v1420_v42 = vpop.eup %1419 }
 0x766   :  { %405 = vrot.lane.b32.xlu0 %v1420_v42, %s1581_s12 }
 0x767   :  { %v1422_v44 = vpop.eup %1421 }
 0x768   :  { %v386_v45 = vadd.f32 1.0, %v1422_v44 }
 0x76a   :  { %1423 = vrcp.f32 %v386_v45  ;;  %v398_v51 = vand.u32 2147483648, %v386_v45  ;;  %vm392_vm15 = vweird.f32 %v386_v45  ;;  %v396_v52 = vand.u32 2147483647, %v386_v45 }
 0x76c   :  { %v399_v54 = vor.u32 1.1754944e-38, %v398_v51  ;;  %vm397_vm2 = vcmp.eq.f32.partialorder %v396_v52, 8.507059e+37 }
 0x770   :  { %v1424_v46 = vpop.eup %1423 }
 0x771   :  { %v388_v47 = vmul.f32 %v1424_v46, %v386_v45  ;;  %vm393_vm14 = vweird.f32 %v1424_v46 }
 0x772   :  { %vm394_vm1 = vmor %vm392_vm15, %vm393_vm14 }
 0x773   :  { %v389_v48 = vsub.f32 1.0, %v388_v47 }
 0x775   :  { %v390_v49 = vmul.f32 %v1424_v46, %v389_v48 }
 0x777   :  { %v391_v50 = vadd.f32 %v1424_v46, %v390_v49 }
 0x779   :  { %v395_v53 = vsel %vm394_vm1, %v1424_v46, %v391_v50 }
 0x77a   :  { %v400_v56 = vsel %vm397_vm2, %v399_v54, %v395_v53 }
 0x77b   :  { %v403_v58 = vmul.f32 %v400_v56, %v345_v31  ;;  %v76_v31 = vld [vmem:[%s1942_s0 + $0x38] sm:$0xff] }
 0x77c   :  { %1345 = vmatmul.msk.f32.gmra.mxu0 %vm80_vm0, %v76_v31 }
 0x7d8   :  { %v406_v55 = vpop.permute.xlu0 %405 }
 0x7d9   :  { %v408_v57 = vmul.f32 %v406_v55, %v400_v56 }
 0x7db   :  { %410 = vrot.lane.b32.xlu1 %v408_v57, %s1581_s12 }
 0x7f9   :  { %v1789_v38 = vpop.f32.mrf.mxu0 }
 0x84d   :  { %v411_v59 = vpop.permute.xlu1 %410 }
 0x84e   :  { %v413_v60 = vadd.f32 %v411_v59, %v403_v58 }
 0x850   :  { %1425 = vtanh.f32 %v413_v60 }
 0x856   :  { %v1426_v61 = vpop.eup %1425 }
 0x857   :  { %416 = vrot.lane.b32.xlu2 %v1426_v61, %s1581_s12 }
 0x8b1   :  { %v417_v62 = vpop.permute.xlu2 %416 }
 0x8b2   :  { %v419_v63 = vmul.f32 %v417_v62, %v400_v56 }
 0x8b4   :  { %421 = vrot.lane.b32.xlu0 %v419_v63, %s1582_s13 }
 0x926   :  { %v422_v3 = vpop.permute.xlu0 %421 }
 0x927   :  { %425 = vst.msk [vmem:[#allocation3 + $0x18] sm:$0xff] %vm155_vm5, %v422_v3  ;;  %1353 = vmatmul.msk.f32.vlgmr.msra.gmra.mxu2 %vm155_vm5, %v422_v3  ;;  %v1807_v3 = vld [vmem:[%s1947_s5 + $0x10] sm:$0xff] }
 0x928   :  { %868 = vmatpush.msra.mxu2 %v1802_v1  ;;  %805 = vmatpush.msrb.mxu1 %v1807_v3 }
 0x92a   :  { %869 = vmatpush.msra.mxu2 %v1807_v3 }
 0x92e   :  { %v710_v4 = vld [vmem:[#allocation3 + $0x18] sm:$0xff] }
 0x92f   :  { %1364 = vmatmul.msk.f32.gmra.mxu3 %vm155_vm5, %v710_v4  ;;  %v1814_v4 = vld [vmem:[%s1947_s5 + $0x8] sm:$0xff] }
 0x930   :  { %806 = vmatpush.msrb.mxu1 %v1814_v4  ;;  %870 = vmatpush.msra.mxu2 %v1814_v4 }
 0x932   :  { %807 = vmatpush.msrb.mxu1 %v1821_v9  ;;  %871 = vmatpush.msra.mxu2 %v1821_v9 }
 0x9aa   :  { %v447_v11 = vpop.f32.mrf.mxu2 }
 0x9ab   :  { %v450_v12 = vadd.f32 %v447_v11, %v135_v10 }
 0x9ad   :  { %1427 = vtanh.f32 %v450_v12  ;;  %v1354_v14 = vmul.f32 -1.442695, %v450_v12  ;;  %v141_v12 = vadd.f32 %v1697_v8, %v1787_v37 }
 0x9af   :  { %1429 = vpow2.f32 %v1354_v14 }
 0x9b3   :  { %v1428_v13 = vpop.eup %1427 }
 0x9b4   :  { %473 = vrot.lane.b32.xlu1 %v1428_v13, %s1581_s12 }
 0x9b5   :  { %v1430_v15 = vpop.eup %1429 }
 0x9b6   :  { %v454_v16 = vadd.f32 1.0, %v1430_v15  ;;  %v1844_v15 = vld [vmem:[%s1948_s6] ss:$0 sm:$0xff] }
 0x9b8   :  { %1431 = vrcp.f32 %v454_v16  ;;  %v466_v19 = vand.u32 2147483648, %v454_v16  ;;  %vm460_vm4 = vweird.f32 %v454_v16  ;;  %v464_v20 = vand.u32 2147483647, %v454_v16 }
 0x9ba   :  { %v467_v21 = vor.u32 1.1754944e-38, %v466_v19  ;;  %vm465_vm7 = vcmp.eq.f32.partialorder %v464_v20, 8.507059e+37 }
 0x9be   :  { %v1432_v17 = vpop.eup %1431 }
 0x9bf   :  { %v456_v18 = vmul.f32 %v1432_v17, %v454_v16  ;;  %vm461_vm3 = vweird.f32 %v1432_v17 }
 0x9c0   :  { %vm462_vm6 = vmor %vm460_vm4, %vm461_vm3 }
 0x9c1   :  { %v457_v0 = vsub.f32 1.0, %v456_v18 }
 0x9c3   :  { %v458_v2 = vmul.f32 %v1432_v17, %v457_v0 }
 0x9c5   :  { %v459_v5 = vadd.f32 %v1432_v17, %v458_v2 }
 0x9c7   :  { %v463_v6 = vsel %vm462_vm6, %v1432_v17, %v459_v5 }
 0x9c8   :  { %v468_v23 = vsel %vm465_vm7, %v467_v21, %v463_v6 }
 0x9c9   :  { %v471_v25 = vmul.f32 %v468_v23, %v413_v60 }
 0xa26   :  { %v474_v22 = vpop.permute.xlu1 %473 }
 0xa27   :  { %v476_v24 = vmul.f32 %v474_v22, %v468_v23 }
 0xa29   :  { %478 = vrot.lane.b32.xlu2 %v476_v24, %s1581_s12 }
 0xa83   :  { %v479_v26 = vpop.permute.xlu2 %478 }
 0xa84   :  { %v481_v27 = vadd.f32 %v479_v26, %v471_v25 }
 0xa86   :  { %1433 = vtanh.f32 %v481_v27 }
 0xa8c   :  { %v1434_v28 = vpop.eup %1433 }
 0xa8d   :  { %484 = vrot.lane.b32.xlu0 %v1434_v28, %s1581_s12 }
 0xaff   :  { %v485_v32 = vpop.permute.xlu0 %484 }
 0xb00   :  { %v487_v33 = vmul.f32 %v485_v32, %v468_v23 }
 0xb02   :  { %489 = vrot.lane.b32.xlu1 %v487_v33, %s1582_s13 }
 0xb74   :  { %v490_v34 = vpop.permute.xlu1 %489 }
 0xb75   :  { %493 = vst.msk [vmem:[#allocation3 + $0x20] sm:$0xff] %vm155_vm5, %v490_v34  ;;  %1355 = vmatmul.msk.f32.vlgmr.msrb.gmra.mxu0 %vm155_vm5, %v490_v34 }
 0xb7c   :  { %v711_v35 = vld [vmem:[#allocation3 + $0x20] sm:$0xff] }
 0xb7d   :  { %1365 = vmatmul.msk.f32.gmra.mxu3 %vm155_vm5, %v711_v35 }
 0xbf2   :  { %v515_v40 = vpop.f32.mrf.mxu0 }
 0xbf3   :  { %v518_v41 = vadd.f32 %v515_v40, %v138_v39 }
 0xbf5   :  { %1435 = vtanh.f32 %v518_v41  ;;  %v1356_v43 = vmul.f32 -1.442695, %v518_v41 }
 0xbf7   :  { %1437 = vpow2.f32 %v1356_v43 }
 0xbfb   :  { %v1436_v42 = vpop.eup %1435 }
 0xbfc   :  { %541 = vrot.lane.b32.xlu2 %v1436_v42, %s1581_s12 }
 0xbfd   :  { %v1438_v44 = vpop.eup %1437 }
 0xbfe   :  { %v522_v45 = vadd.f32 1.0, %v1438_v44 }
 0xc00   :  { %1439 = vrcp.f32 %v522_v45  ;;  %v534_v51 = vand.u32 2147483648, %v522_v45  ;;  %vm528_vm8 = vweird.f32 %v522_v45  ;;  %v532_v52 = vand.u32 2147483647, %v522_v45 }
 0xc02   :  { %v535_v54 = vor.u32 1.1754944e-38, %v534_v51  ;;  %vm533_vm10 = vcmp.eq.f32.partialorder %v532_v52, 8.507059e+37 }
 0xc06   :  { %v1440_v46 = vpop.eup %1439 }
 0xc07   :  { %v524_v47 = vmul.f32 %v1440_v46, %v522_v45  ;;  %vm529_vm0 = vweird.f32 %v1440_v46 }
 0xc08   :  { %vm530_vm9 = vmor %vm528_vm8, %vm529_vm0 }
 0xc09   :  { %v525_v48 = vsub.f32 1.0, %v524_v47 }
 0xc0b   :  { %v526_v49 = vmul.f32 %v1440_v46, %v525_v48 }
 0xc0d   :  { %v527_v50 = vadd.f32 %v1440_v46, %v526_v49 }
 0xc0f   :  { %v531_v53 = vsel %vm530_vm9, %v1440_v46, %v527_v50 }
 0xc10   :  { %v536_v56 = vsel %vm533_vm10, %v535_v54, %v531_v53 }
 0xc11   :  { %v539_v58 = vmul.f32 %v536_v56, %v481_v27 }
 0xc56   :  { %v542_v55 = vpop.permute.xlu2 %541 }
 0xc57   :  { %v544_v57 = vmul.f32 %v542_v55, %v536_v56 }
 0xc59   :  { %546 = vrot.lane.b32.xlu0 %v544_v57, %s1581_s12 }
 0xccb   :  { %v547_v59 = vpop.permute.xlu0 %546 }
 0xccc   :  { %v1794_v60 = vadd.f32 %v547_v59, %v539_v58 }
 0xcce   :  { %1441 = vtanh.f32 %v1794_v60 }
 0xcd4   :  { %v1442_v61 = vpop.eup %1441 }
 0xcd5   :  { %552 = vrot.lane.b32.xlu1 %v1442_v61, %s1581_s12 }
 0xd47   :  { %v553_v62 = vpop.permute.xlu1 %552 }
 0xd48   :  { %v555_v63 = vmul.f32 %v553_v62, %v536_v56 }
 0xd4a   :  { %557 = vrot.lane.b32.xlu2 %v555_v63, %s1582_s13 }
 0xda4   :  { %v558_v10 = vpop.permute.xlu2 %557 }
 0xda5   :  { %561 = vst.msk [vmem:[#allocation3 + $0x28] sm:$0xff] %vm155_vm5, %v558_v10  ;;  %1357 = vmatmul.msk.f32.vlgmr.msra.gmra.mxu1 %vm155_vm5, %v558_v10 }
 0xda6   :  { %932 = vmatpush.msra.mxu1 %v1802_v1 }
 0xda8   :  { %933 = vmatpush.msra.mxu1 %v1807_v3 }
 0xdaa   :  { %934 = vmatpush.msra.mxu1 %v1814_v4 }
 0xdac   :  { %v712_v11 = vld [vmem:[#allocation3 + $0x28] sm:$0xff]  ;;  %935 = vmatpush.msra.mxu1 %v1821_v9 }
 0xdad   :  { %1366 = vmatmul.msk.f32.gmra.mxu3 %vm155_vm5, %v712_v11  ;;  %808 = vmatmul.f32.vlgmr.msrb.gmra.mxu1 %v1580_v7  ;;  %v759_v7 = vpop.f32.mrf.mxu3 }
 0xdae   :  { %1060 = vmatpush.msrb.mxu1 %v1802_v1  ;;  %v760_v16 = vadd.f32 %v1844_v15, %v759_v7 }
 0xdb0   :  { %1061 = vmatpush.msrb.mxu1 %v1807_v3 }
 0xdb2   :  { %1062 = vmatpush.msrb.mxu1 %v1814_v4 }
 0xdb4   :  { %1063 = vmatpush.msrb.mxu1 %v1821_v9 }
 0xdb5   :  { %v762_v63 = vpop.f32.mrf.mxu3 }
 0xdb6   :  { %v763_v10 = vadd.f32 %v1844_v15, %v762_v63 }
 0xe22   :  { %v583_v13 = vpop.f32.mrf.mxu1 }
 0xe23   :  { %v586_v14 = vadd.f32 %v583_v13, %v141_v12 }
 0xe25   :  { %1443 = vtanh.f32 %v586_v14  ;;  %v1358_v8 = vmul.f32 -1.442695, %v586_v14 }
 0xe2a   :  { %v809_v17 = vpop.f32.mrf.mxu1 }
 0xe2b   :  { %v1444_v18 = vpop.eup %1443  ;;  %v812_v0 = vadd.f32 %v809_v17, %v760_v16 }
 0xe2c   :  { %609 = vrot.lane.b32.xlu0 %v1444_v18, %s1581_s12 }
 0xe2d   :  { %1445 = vtanh.f32 %v812_v0  ;;  %v1369_v5 = vmul.f32 -1.442695, %v812_v0 }
 0xe2e   :  { %1447 = vpow2.f32 %v1358_v8 }
 0xe2f   :  { %1449 = vpow2.f32 %v1369_v5 }
 0xe33   :  { %v1446_v2 = vpop.eup %1445 }
 0xe34   :  { %835 = vrot.lane.b32.xlu1 %v1446_v2, %s1581_s12  ;;  %v1448_v19 = vpop.eup %1447 }
 0xe35   :  { %v590_v20 = vadd.f32 1.0, %v1448_v19  ;;  %v1450_v6 = vpop.eup %1449 }
 0xe36   :  { %v816_v21 = vadd.f32 1.0, %v1450_v6 }
 0xe37   :  { %1451 = vrcp.f32 %v590_v20  ;;  %v602_v30 = vand.u32 2147483648, %v590_v20  ;;  %vm596_vm12 = vweird.f32 %v590_v20  ;;  %v600_v31 = vand.u32 2147483647, %v590_v20 }
 0xe38   :  { %1453 = vrcp.f32 %v816_v21  ;;  %v828_v40 = vand.u32 2147483648, %v816_v21  ;;  %vm822_vm1 = vweird.f32 %v816_v21  ;;  %v826_v41 = vand.u32 2147483647, %v816_v21 }
 0xe39   :  { %v603_v34 = vor.u32 1.1754944e-38, %v602_v30  ;;  %vm601_vm14 = vcmp.eq.f32.partialorder %v600_v31, 8.507059e+37  ;;  %v765_v31 = vpop.f32.mrf.mxu3 }
 0xe3a   :  { %v829_v43 = vor.u32 1.1754944e-38, %v828_v40  ;;  %vm827_vm3 = vcmp.eq.f32.partialorder %v826_v41, 8.507059e+37 }
 0xe3d   :  { %v1452_v22 = vpop.eup %1451 }
 0xe3e   :  { %v592_v23 = vmul.f32 %v1452_v22, %v590_v20  ;;  %v1454_v25 = vpop.eup %1453  ;;  %vm597_vm11 = vweird.f32 %v1452_v22 }
 0xe3f   :  { %v818_v27 = vmul.f32 %v1454_v25, %v816_v21  ;;  %vm598_vm13 = vmor %vm596_vm12, %vm597_vm11  ;;  %vm823_vm15 = vweird.f32 %v1454_v25 }
 0xe40   :  { %v593_v24 = vsub.f32 1.0, %v592_v23  ;;  %vm824_vm2 = vmor %vm822_vm1, %vm823_vm15 }
 0xe41   :  { %v819_v29 = vsub.f32 1.0, %v818_v27 }
 0xe42   :  { %v594_v26 = vmul.f32 %v1452_v22, %v593_v24 }
 0xe43   :  { %v820_v33 = vmul.f32 %v1454_v25, %v819_v29 }
 0xe44   :  { %v595_v28 = vadd.f32 %v1452_v22, %v594_v26 }
 0xe45   :  { %v821_v39 = vadd.f32 %v1454_v25, %v820_v33 }
 0xe46   :  { %v599_v32 = vsel %vm598_vm13, %v1452_v22, %v595_v28 }
 0xe47   :  { %v604_v36 = vsel %vm601_vm14, %v603_v34, %v599_v32  ;;  %v825_v42 = vsel %vm824_vm2, %v1454_v25, %v821_v39  ;;  %v766_v32 = vadd.f32 %v1844_v15, %v765_v31 }
 0xe48   :  { %v830_v45 = vsel %vm827_vm3, %v829_v43, %v825_v42  ;;  %v607_v47 = vmul.f32 %v604_v36, %v1794_v60 }
 0xe49   :  { %v833_v51 = vmul.f32 0.0, %v830_v45 }
 0xe9e   :  { %v610_v35 = vpop.permute.xlu0 %609 }
 0xe9f   :  { %v612_v37 = vmul.f32 %v610_v35, %v604_v36 }
 0xea1   :  { %614 = vrot.lane.b32.xlu2 %v612_v37, %s1581_s12 }
 0xea6   :  { %v836_v44 = vpop.permute.xlu1 %835 }
 0xea7   :  { %v838_v46 = vmul.f32 %v836_v44, %v830_v45 }
 0xea9   :  { %840 = vrot.lane.b32.xlu0 %v838_v46, %s1581_s12 }
 0xefb   :  { %v615_v48 = vpop.permute.xlu2 %614 }
 0xefc   :  { %v1852_v49 = vadd.f32 %v615_v48, %v607_v47 }
 0xefe   :  { %1455 = vtanh.f32 %v1852_v49 }
 0xf04   :  { %v1456_v50 = vpop.eup %1455 }
 0xf05   :  { %620 = vrot.lane.b32.xlu1 %v1456_v50, %s1581_s12 }
 0xf1b   :  { %v841_v52 = vpop.permute.xlu0 %840 }
 0xf1c   :  { %v843_v53 = vadd.f32 %v841_v52, %v833_v51 }
 0xf1e   :  { %1457 = vtanh.f32 %v843_v53 }
 0xf24   :  { %v1458_v54 = vpop.eup %1457 }
 0xf25   :  { %846 = vrot.lane.b32.xlu2 %v1458_v54, %s1581_s12 }
 0xf77   :  { %v621_v55 = vpop.permute.xlu1 %620 }
 0xf78   :  { %v623_v56 = vmul.f32 %v621_v55, %v604_v36 }
 0xf7a   :  { %625 = vrot.lane.b32.xlu0 %v623_v56, %s1582_s13 }
 0xf7f   :  { %v847_v57 = vpop.permute.xlu2 %846 }
 0xf80   :  { %v849_v58 = vmul.f32 %v847_v57, %v830_v45 }
 0xf82   :  { %852 = vrot.lane.b32.xlu1 %v849_v58, %s1582_s13 }
 0xfec   :  { %v626_v59 = vpop.permute.xlu0 %625 }
 0xfed   :  { %629 = vst.msk [vmem:[#allocation3 + $0x30] sm:$0xff] %vm155_vm5, %v626_v59  ;;  %1359 = vmatmul.msk.f32.vlgmr.msrb.gmra.mxu2 %vm155_vm5, %v626_v59 }
 0xfee   :  { %996 = vmatpush.msrb.mxu2 %v1802_v1 }
 0xff0   :  { %997 = vmatpush.msrb.mxu2 %v1807_v3 }
 0xff2   :  { %998 = vmatpush.msrb.mxu2 %v1814_v4 }
 0xff4   :  { %v853_v60 = vpop.permute.xlu1 %852  ;;  %v713_v61 = vld [vmem:[#allocation3 + $0x30] sm:$0xff]  ;;  %999 = vmatpush.msrb.mxu2 %v1821_v9 }
 0xff5   :  { %1367 = vmatmul.msk.f32.gmra.mxu3 %vm155_vm5, %v713_v61  ;;  %1370 = vmatmul.msk.f32.vlgmr.msra.gmra.mxu2 %vm155_vm5, %v853_v60  ;;  %v768_v60 = vpop.f32.mrf.mxu3 }
 0xff6   :  { %1124 = vmatpush.msra.mxu2 %v1802_v1  ;;  %v769_v61 = vadd.f32 %v1844_v15, %v768_v60 }
 0xff8   :  { %1125 = vmatpush.msra.mxu2 %v1807_v3 }
 0xffa   :  { %1126 = vmatpush.msra.mxu2 %v1814_v4 }
 0xffc   :  { %1127 = vmatpush.msra.mxu2 %v1821_v9 }
0x1070   :  { %v1871_v62 = vpop.f32.mrf.mxu2 }
0x1078   :  { %v873_v11 = vpop.f32.mrf.mxu2 }
0x1079   :  { %v876_v12 = vadd.f32 %v873_v11, %v763_v10 }
0x107b   :  { %1459 = vtanh.f32 %v876_v12  ;;  %v1371_v14 = vmul.f32 -1.442695, %v876_v12 }
0x107d   :  { %1461 = vpow2.f32 %v1371_v14 }
0x1081   :  { %v1460_v13 = vpop.eup %1459 }
0x1082   :  { %899 = vrot.lane.b32.xlu2 %v1460_v13, %s1581_s12 }
0x1083   :  { %v1462_v7 = vpop.eup %1461 }
0x1084   :  { %v880_v16 = vadd.f32 1.0, %v1462_v7 }
0x1086   :  { %1463 = vrcp.f32 %v880_v16  ;;  %v892_v5 = vand.u32 2147483648, %v880_v16  ;;  %vm886_vm6 = vweird.f32 %v880_v16  ;;  %v890_v19 = vand.u32 2147483647, %v880_v16 }
0x1088   :  { %v893_v6 = vor.u32 1.1754944e-38, %v892_v5  ;;  %vm891_vm0 = vcmp.eq.f32.partialorder %v890_v19, 8.507059e+37 }
0x108c   :  { %v1464_v17 = vpop.eup %1463 }
0x108d   :  { %v882_v18 = vmul.f32 %v1464_v17, %v880_v16  ;;  %vm887_vm4 = vweird.f32 %v1464_v17 }
0x108e   :  { %vm888_vm7 = vmor %vm886_vm6, %vm887_vm4 }
0x108f   :  { %v883_v0 = vsub.f32 1.0, %v882_v18 }
0x1091   :  { %v884_v2 = vmul.f32 %v1464_v17, %v883_v0 }
0x1093   :  { %v885_v8 = vadd.f32 %v1464_v17, %v884_v2 }
0x1095   :  { %v889_v20 = vsel %vm888_vm7, %v1464_v17, %v885_v8 }
0x1096   :  { %v894_v22 = vsel %vm891_vm0, %v893_v6, %v889_v20 }
0x1097   :  { %v897_v24 = vmul.f32 %v894_v22, %v843_v53 }
0x10dc   :  { %v900_v21 = vpop.permute.xlu2 %899 }
0x10dd   :  { %v902_v23 = vmul.f32 %v900_v21, %v894_v22 }
0x10df   :  { %904 = vrot.lane.b32.xlu0 %v902_v23, %s1581_s12 }
0x1151   :  { %v905_v25 = vpop.permute.xlu0 %904 }
0x1152   :  { %v907_v26 = vadd.f32 %v905_v25, %v897_v24  ;;  %v771_v25 = vpop.f32.mrf.mxu3 }
0x1154   :  { %1465 = vtanh.f32 %v907_v26 }
0x115a   :  { %v1466_v27 = vpop.eup %1465 }
0x115b   :  { %910 = vrot.lane.b32.xlu1 %v1466_v27, %s1581_s12 }
0x11cd   :  { %v911_v28 = vpop.permute.xlu1 %910 }
0x11ce   :  { %v913_v29 = vmul.f32 %v911_v28, %v894_v22 }
0x11d0   :  { %916 = vrot.lane.b32.xlu2 %v913_v29, %s1582_s13 }
0x122a   :  { %v917_v30 = vpop.permute.xlu2 %916 }
0x122b   :  { %1372 = vmatmul.msk.f32.vlgmr.msra.gmra.mxu1 %vm155_vm5, %v917_v30 }
0x122c   :  { %1188 = vmatpush.msra.mxu1 %v1802_v1 }
0x122e   :  { %1189 = vmatpush.msra.mxu1 %v1807_v3 }
0x1230   :  { %1190 = vmatpush.msra.mxu1 %v1814_v4 }
0x1232   :  { %1191 = vmatpush.msra.mxu1 %v1821_v9 }
0x12a8   :  { %v937_v33 = vpop.f32.mrf.mxu1 }
0x12a9   :  { %v940_v34 = vadd.f32 %v937_v33, %v766_v32 }
0x12ab   :  { %1467 = vtanh.f32 %v940_v34  ;;  %v1373_v36 = vmul.f32 -1.442695, %v940_v34 }
0x12ad   :  { %1469 = vpow2.f32 %v1373_v36 }
0x12b1   :  { %v1468_v35 = vpop.eup %1467 }
0x12b2   :  { %963 = vrot.lane.b32.xlu0 %v1468_v35, %s1581_s12 }
0x12b3   :  { %v1470_v37 = vpop.eup %1469 }
0x12b4   :  { %v944_v39 = vadd.f32 1.0, %v1470_v37 }
0x12b6   :  { %1471 = vrcp.f32 %v944_v39  ;;  %v956_v45 = vand.u32 2147483648, %v944_v39  ;;  %vm950_vm9 = vweird.f32 %v944_v39  ;;  %v954_v46 = vand.u32 2147483647, %v944_v39 }
0x12b8   :  { %v957_v48 = vor.u32 1.1754944e-38, %v956_v45  ;;  %vm955_vm11 = vcmp.eq.f32.partialorder %v954_v46, 8.507059e+37 }
0x12bc   :  { %v1472_v40 = vpop.eup %1471 }
0x12bd   :  { %v946_v41 = vmul.f32 %v1472_v40, %v944_v39  ;;  %vm951_vm8 = vweird.f32 %v1472_v40 }
0x12be   :  { %vm952_vm10 = vmor %vm950_vm9, %vm951_vm8 }
0x12bf   :  { %v947_v42 = vsub.f32 1.0, %v946_v41 }
0x12c1   :  { %v948_v43 = vmul.f32 %v1472_v40, %v947_v42 }
0x12c3   :  { %v949_v44 = vadd.f32 %v1472_v40, %v948_v43 }
0x12c5   :  { %v953_v47 = vsel %vm952_vm10, %v1472_v40, %v949_v44 }
0x12c6   :  { %v958_v51 = vsel %vm955_vm11, %v957_v48, %v953_v47 }
0x12c7   :  { %v961_v53 = vmul.f32 %v958_v51, %v907_v26  ;;  %v772_v26 = vadd.f32 %v1844_v15, %v771_v25 }
0x1324   :  { %v964_v50 = vpop.permute.xlu0 %963 }
0x1325   :  { %v966_v52 = vmul.f32 %v964_v50, %v958_v51 }
0x1327   :  { %968 = vrot.lane.b32.xlu1 %v966_v52, %s1581_s12 }
0x1399   :  { %v969_v54 = vpop.permute.xlu1 %968 }
0x139a   :  { %v971_v55 = vadd.f32 %v969_v54, %v961_v53  ;;  %v774_v54 = vpop.f32.mrf.mxu3 }
0x139c   :  { %1473 = vtanh.f32 %v971_v55 }
0x13a2   :  { %v1474_v56 = vpop.eup %1473 }
0x13a3   :  { %974 = vrot.lane.b32.xlu2 %v1474_v56, %s1581_s12 }
0x13fd   :  { %v975_v57 = vpop.permute.xlu2 %974 }
0x13fe   :  { %v977_v58 = vmul.f32 %v975_v57, %v958_v51 }
0x1400   :  { %980 = vrot.lane.b32.xlu0 %v977_v58, %s1582_s13 }
0x1472   :  { %v981_v59 = vpop.permute.xlu0 %980 }
0x1473   :  { %1374 = vmatmul.msk.f32.vlgmr.msrb.gmra.mxu2 %vm155_vm5, %v981_v59 }
0x1474   :  { %1252 = vmatpush.msrb.mxu2 %v1802_v1 }
0x1476   :  { %1253 = vmatpush.msrb.mxu2 %v1807_v3 }
0x1478   :  { %1254 = vmatpush.msrb.mxu2 %v1814_v4 }
0x147a   :  { %1255 = vmatpush.msrb.mxu2 %v1821_v9 }
0x14f6   :  { %v1001_v63 = vpop.f32.mrf.mxu2 }
0x14f7   :  { %v1004_v10 = vadd.f32 %v1001_v63, %v769_v61 }
0x14f9   :  { %1475 = vtanh.f32 %v1004_v10  ;;  %v1375_v12 = vmul.f32 -1.442695, %v1004_v10 }
0x14fb   :  { %1477 = vpow2.f32 %v1375_v12 }
0x14ff   :  { %v1476_v11 = vpop.eup %1475 }
0x1500   :  { %1027 = vrot.lane.b32.xlu1 %v1476_v11, %s1581_s12 }
0x1501   :  { %v1478_v13 = vpop.eup %1477 }
0x1502   :  { %v1008_v14 = vadd.f32 1.0, %v1478_v13 }
0x1504   :  { %1479 = vrcp.f32 %v1008_v14  ;;  %v1020_v9 = vand.u32 2147483648, %v1008_v14  ;;  %vm1014_vm13 = vweird.f32 %v1008_v14  ;;  %v1018_v17 = vand.u32 2147483647, %v1008_v14 }
0x1506   :  { %v1021_v0 = vor.u32 1.1754944e-38, %v1020_v9  ;;  %vm1019_vm15 = vcmp.eq.f32.partialorder %v1018_v17, 8.507059e+37 }
0x150a   :  { %v1480_v1 = vpop.eup %1479 }
0x150b   :  { %v1010_v3 = vmul.f32 %v1480_v1, %v1008_v14  ;;  %vm1015_vm12 = vweird.f32 %v1480_v1 }
0x150c   :  { %vm1016_vm14 = vmor %vm1014_vm13, %vm1015_vm12 }
0x150d   :  { %v1011_v7 = vsub.f32 1.0, %v1010_v3 }
0x150f   :  { %v1012_v4 = vmul.f32 %v1480_v1, %v1011_v7  ;;  %v1523_v7 = vld [vmem:[%s1945_s3] ss:$0 sm:$0xff] }
0x1511   :  { %v1013_v16 = vadd.f32 %v1480_v1, %v1012_v4  ;;  %v144_v4 = vadd.f32 %v1523_v7, %v1789_v38 }
0x1513   :  { %v1017_v18 = vsel %vm1016_vm14, %v1480_v1, %v1013_v16  ;;  %v654_v9 = vadd.f32 %v1871_v62, %v144_v4 }
0x1514   :  { %v1022_v8 = vsel %vm1019_vm15, %v1021_v0, %v1017_v18 }
0x1515   :  { %v1025_v19 = vmul.f32 %v1022_v8, %v971_v55  ;;  %v775_v55 = vadd.f32 %v1844_v15, %v774_v54 }
0x1572   :  { %v1028_v2 = vpop.permute.xlu1 %1027 }
0x1573   :  { %v1030_v5 = vmul.f32 %v1028_v2, %v1022_v8 }
0x1575   :  { %1032 = vrot.lane.b32.xlu2 %v1030_v5, %s1581_s12 }
0x15cf   :  { %v1033_v20 = vpop.permute.xlu2 %1032 }
0x15d0   :  { %v1035_v6 = vadd.f32 %v1033_v20, %v1025_v19  ;;  %v1360_v20 = vmul.f32 -1.442695, %v654_v9 }
0x15d2   :  { %1481 = vtanh.f32 %v1035_v6 }
0x15d8   :  { %v1482_v21 = vpop.eup %1481 }
0x15d9   :  { %1038 = vrot.lane.b32.xlu0 %v1482_v21, %s1581_s12 }
0x164b   :  { %v1039_v22 = vpop.permute.xlu0 %1038 }
0x164c   :  { %v1041_v23 = vmul.f32 %v1039_v22, %v1022_v8 }
0x164e   :  { %1044 = vrot.lane.b32.xlu1 %v1041_v23, %s1582_s13 }
0x16c0   :  { %v1045_v24 = vpop.permute.xlu1 %1044 }
0x16c1   :  { %1376 = vmatmul.msk.f32.vlgmr.msrb.gmra.mxu1 %vm155_vm5, %v1045_v24 }
0x173e   :  { %v1065_v27 = vpop.f32.mrf.mxu1 }
0x173f   :  { %v1068_v28 = vadd.f32 %v1065_v27, %v772_v26 }
0x1741   :  { %1483 = vtanh.f32 %v1068_v28  ;;  %v1377_v30 = vmul.f32 -1.442695, %v1068_v28 }
0x1743   :  { %1485 = vpow2.f32 %v1377_v30 }
0x1747   :  { %v1484_v29 = vpop.eup %1483 }
0x1748   :  { %1091 = vrot.lane.b32.xlu2 %v1484_v29, %s1581_s12 }
0x1749   :  { %v1486_v31 = vpop.eup %1485 }
0x174a   :  { %v1072_v32 = vadd.f32 1.0, %v1486_v31 }
0x174c   :  { %1487 = vrcp.f32 %v1072_v32  ;;  %v1084_v39 = vand.u32 2147483648, %v1072_v32  ;;  %vm1078_vm2 = vweird.f32 %v1072_v32  ;;  %v1082_v40 = vand.u32 2147483647, %v1072_v32 }
0x174e   :  { %v1085_v42 = vor.u32 1.1754944e-38, %v1084_v39  ;;  %vm1083_vm4 = vcmp.eq.f32.partialorder %v1082_v40, 8.507059e+37 }
0x1752   :  { %v1488_v33 = vpop.eup %1487 }
0x1753   :  { %v1074_v34 = vmul.f32 %v1488_v33, %v1072_v32  ;;  %vm1079_vm1 = vweird.f32 %v1488_v33 }
0x1754   :  { %vm1080_vm3 = vmor %vm1078_vm2, %vm1079_vm1 }
0x1755   :  { %v1075_v35 = vsub.f32 1.0, %v1074_v34 }
0x1757   :  { %v1076_v36 = vmul.f32 %v1488_v33, %v1075_v35 }
0x1759   :  { %v1077_v37 = vadd.f32 %v1488_v33, %v1076_v36  ;;  %v777_v36 = vpop.f32.mrf.mxu3 }
0x175b   :  { %v1081_v41 = vsel %vm1080_vm3, %v1488_v33, %v1077_v37  ;;  %v778_v37 = vadd.f32 %v1844_v15, %v777_v36 }
0x175c   :  { %v1086_v44 = vsel %vm1083_vm4, %v1085_v42, %v1081_v41 }
0x175d   :  { %v1089_v46 = vmul.f32 %v1086_v44, %v1035_v6 }
0x17a2   :  { %v1092_v43 = vpop.permute.xlu2 %1091 }
0x17a3   :  { %v1094_v45 = vmul.f32 %v1092_v43, %v1086_v44 }
0x17a5   :  { %1096 = vrot.lane.b32.xlu0 %v1094_v45, %s1581_s12 }
0x1817   :  { %v1097_v47 = vpop.permute.xlu0 %1096 }
0x1818   :  { %v1099_v48 = vadd.f32 %v1097_v47, %v1089_v46 }
0x181a   :  { %1489 = vtanh.f32 %v1099_v48 }
0x1820   :  { %v1490_v50 = vpop.eup %1489 }
0x1821   :  { %1102 = vrot.lane.b32.xlu1 %v1490_v50, %s1581_s12 }
0x1893   :  { %v1103_v51 = vpop.permute.xlu1 %1102 }
0x1894   :  { %v1105_v52 = vmul.f32 %v1103_v51, %v1086_v44 }
0x1896   :  { %1108 = vrot.lane.b32.xlu2 %v1105_v52, %s1582_s13 }
0x18f0   :  { %v1109_v53 = vpop.permute.xlu2 %1108 }
0x18f1   :  { %1378 = vmatmul.msk.f32.vlgmr.msra.gmra.mxu2 %vm155_vm5, %v1109_v53 }
0x1974   :  { %v1129_v56 = vpop.f32.mrf.mxu2 }
0x1975   :  { %v1132_v57 = vadd.f32 %v1129_v56, %v775_v55 }
0x1977   :  { %1491 = vtanh.f32 %v1132_v57  ;;  %v1379_v59 = vmul.f32 -1.442695, %v1132_v57 }
0x1979   :  { %1493 = vpow2.f32 %v1379_v59 }
0x197d   :  { %v1492_v58 = vpop.eup %1491 }
0x197e   :  { %1155 = vrot.lane.b32.xlu0 %v1492_v58, %s1581_s12 }
0x197f   :  { %v1494_v60 = vpop.eup %1493 }
0x1980   :  { %v1136_v61 = vadd.f32 1.0, %v1494_v60 }
0x1982   :  { %1495 = vrcp.f32 %v1136_v61  ;;  %v1148_v14 = vand.u32 2147483648, %v1136_v61  ;;  %vm1142_vm7 = vweird.f32 %v1136_v61  ;;  %v1146_v1 = vand.u32 2147483647, %v1136_v61 }
0x1983   :  { %1497 = vtanh.f32 %v654_v9 }
0x1984   :  { %v1149_v16 = vor.u32 1.1754944e-38, %v1148_v14  ;;  %vm1147_vm8 = vcmp.eq.f32.partialorder %v1146_v1, 8.507059e+37 }
0x1988   :  { %v1496_v63 = vpop.eup %1495 }
0x1989   :  { %v1138_v10 = vmul.f32 %v1496_v63, %v1136_v61  ;;  %vm1143_vm6 = vweird.f32 %v1496_v63  ;;  %v1498_v2 = vpop.eup %1497 }
0x198a   :  { %vm1144_vm0 = vmor %vm1142_vm7, %vm1143_vm6 }
0x198b   :  { %v1139_v11 = vsub.f32 1.0, %v1138_v10 }
0x198d   :  { %v1140_v12 = vmul.f32 %v1496_v63, %v1139_v11 }
0x198f   :  { %v1141_v13 = vadd.f32 %v1496_v63, %v1140_v12 }
0x1991   :  { %v1145_v3 = vsel %vm1144_vm0, %v1496_v63, %v1141_v13 }
0x1992   :  { %v1150_v18 = vsel %vm1147_vm8, %v1149_v16, %v1145_v3 }
0x1993   :  { %v1153_v8 = vmul.f32 %v1150_v18, %v1099_v48 }
0x19f0   :  { %v1156_v17 = vpop.permute.xlu0 %1155 }
0x19f1   :  { %v1158_v0 = vmul.f32 %v1156_v17, %v1150_v18 }
0x19f3   :  { %1160 = vrot.lane.b32.xlu1 %v1158_v0, %s1581_s12 }
0x19fb   :  { %677 = vrot.lane.b32.xlu1 %v1498_v2, %s1581_s12 }
0x1a65   :  { %v1161_v5 = vpop.permute.xlu1 %1160 }
0x1a66   :  { %v1914_v19 = vadd.f32 %v1161_v5, %v1153_v8 }
0x1a68   :  { %1499 = vtanh.f32 %v1914_v19 }
0x1a69   :  { %1501 = vpow2.f32 %v1360_v20 }
0x1a6d   :  { %v678_v32 = vpop.permute.xlu1 %677 }
0x1a6e   :  { %v1500_v38 = vpop.eup %1499 }
0x1a6f   :  { %1166 = vrot.lane.b32.xlu2 %v1500_v38, %s1581_s12  ;;  %v1502_v62 = vpop.eup %1501 }
0x1a70   :  { %v658_v6 = vadd.f32 1.0, %v1502_v62 }
0x1a72   :  { %1503 = vrcp.f32 %v658_v6  ;;  %v670_v28 = vand.u32 2147483648, %v658_v6  ;;  %vm664_vm10 = vweird.f32 %v658_v6  ;;  %v668_v29 = vand.u32 2147483647, %v658_v6 }
0x1a74   :  { %v671_v31 = vor.u32 1.1754944e-38, %v670_v28  ;;  %vm669_vm12 = vcmp.eq.f32.partialorder %v668_v29, 8.507059e+37 }
0x1a78   :  { %v1504_v21 = vpop.eup %1503 }
0x1a79   :  { %v660_v22 = vmul.f32 %v1504_v21, %v658_v6  ;;  %vm665_vm9 = vweird.f32 %v1504_v21 }
0x1a7a   :  { %vm666_vm11 = vmor %vm664_vm10, %vm665_vm9 }
0x1a7b   :  { %v661_v23 = vsub.f32 1.0, %v660_v22 }
0x1a7d   :  { %v662_v24 = vmul.f32 %v1504_v21, %v661_v23 }
0x1a7f   :  { %v663_v26 = vadd.f32 %v1504_v21, %v662_v24 }
0x1a81   :  { %v667_v30 = vsel %vm666_vm11, %v1504_v21, %v663_v26 }
0x1a82   :  { %v672_v33 = vsel %vm669_vm12, %v671_v31, %v667_v30  ;;  %v1301_v31 = vld [vmem:[#allocation4 + $0x18] sm:$0xff] }
0x1a83   :  { %v680_v34 = vmul.f32 %v678_v32, %v672_v33  ;;  %v675_v42 = vmul.f32 %v672_v33, %v1852_v49  ;;  %v1300_v32 = vld [vmem:[#allocation4 + $0x10] sm:$0xff]  ;;  %1323 = vmatpush.msrb.mxu1 %v1301_v31 }
0x1a85   :  { %1324 = vmatpush.msrb.mxu1 %v1300_v32 }
0x1ac9   :  { %v1167_v25 = vpop.permute.xlu2 %1166 }
0x1aca   :  { %v1169_v27 = vmul.f32 %v1167_v25, %v1150_v18 }
0x1acc   :  { %1172 = vrot.lane.b32.xlu0 %v1169_v27, %s1582_s13 }
0x1ad4   :  { %682 = vrot.lane.b32.xlu0 %v680_v34, %s1581_s12  ;;  %v1298_v34 = vld [vmem:[#allocation4] sm:$0xff] }
0x1b3e   :  { %v1173_v35 = vpop.permute.xlu0 %1172 }
0x1b3f   :  { %1380 = vmatmul.msk.f32.vlgmr.msra.gmra.mxu1 %vm155_vm5, %v1173_v35 }
0x1b46   :  { %v683_v41 = vpop.permute.xlu0 %682 }
0x1b47   :  { %v685_v43 = vadd.f32 %v683_v41, %v675_v42 }
0x1bbc   :  { %v1193_v39 = vpop.f32.mrf.mxu1 }
0x1bbd   :  { %v1196_v40 = vadd.f32 %v1193_v39, %v778_v37  ;;  %v1394_v39 = vld [vmem:[#allocation6] ss:$0 sm:$0xff] }
0x1bbf   :  { %1505 = vtanh.f32 %v1196_v40  ;;  %v1381_v46 = vmul.f32 -1.442695, %v1196_v40 }
0x1bc0   :  { %1507 = vtanh.f32 %v685_v43 }
0x1bc1   :  { %1509 = vpow2.f32 %v1381_v46 }
0x1bc5   :  { %v1506_v44 = vpop.eup %1505 }
0x1bc6   :  { %1219 = vrot.lane.b32.xlu2 %v1506_v44, %s1581_s12  ;;  %v1508_v45 = vpop.eup %1507 }
0x1bc7   :  { %v1510_v47 = vpop.eup %1509 }
0x1bc8   :  { %v1200_v48 = vadd.f32 1.0, %v1510_v47 }
0x1bca   :  { %1511 = vrcp.f32 %v1200_v48  ;;  %v1212_v49 = vand.u32 2147483648, %v1200_v48  ;;  %vm1206_vm14 = vweird.f32 %v1200_v48  ;;  %v1210_v55 = vand.u32 2147483647, %v1200_v48 }
0x1bcc   :  { %v1213_v57 = vor.u32 1.1754944e-38, %v1212_v49  ;;  %vm1211_vm1 = vcmp.eq.f32.partialorder %v1210_v55, 8.507059e+37 }
0x1bce   :  { %688 = vrot.lane.b32.xlu2 %v1508_v45, %s1581_s12 }
0x1bd0   :  { %v1512_v50 = vpop.eup %1511 }
0x1bd1   :  { %v1202_v51 = vmul.f32 %v1512_v50, %v1200_v48  ;;  %vm1207_vm13 = vweird.f32 %v1512_v50 }
0x1bd2   :  { %vm1208_vm15 = vmor %vm1206_vm14, %vm1207_vm13 }
0x1bd3   :  { %v1203_v52 = vsub.f32 1.0, %v1202_v51 }
0x1bd5   :  { %v1204_v53 = vmul.f32 %v1512_v50, %v1203_v52 }
0x1bd7   :  { %v1205_v54 = vadd.f32 %v1512_v50, %v1204_v53 }
0x1bd9   :  { %v1209_v56 = vsel %vm1208_vm15, %v1512_v50, %v1205_v54 }
0x1bda   :  { %v1214_v59 = vsel %vm1211_vm1, %v1213_v57, %v1209_v56 }
0x1bdb   :  { %v1217_v10 = vmul.f32 %v1214_v59, %v1914_v19 }
0x1c20   :  { %v1220_v58 = vpop.permute.xlu2 %1219 }
0x1c21   :  { %v1222_v60 = vmul.f32 %v1220_v58, %v1214_v59 }
0x1c23   :  { %1224 = vrot.lane.b32.xlu1 %v1222_v60, %s1581_s12 }
0x1c28   :  { %v689_v61 = vpop.permute.xlu2 %688 }
0x1c29   :  { %v691_v63 = vmul.f32 %v689_v61, %v672_v33  ;;  %v1299_v33 = vld [vmem:[#allocation4 + $0x8] sm:$0xff] }
0x1c2a   :  { %1325 = vmatpush.msrb.mxu1 %v1299_v33 }
0x1c2b   :  { %693 = vrot.lane.b32.xlu1 %v691_v63, %s1582_s13 }
0x1c2c   :  { %1326 = vmatpush.msrb.mxu1 %v1298_v34 }
0x1c95   :  { %v1225_v11 = vpop.permute.xlu1 %1224 }
0x1c96   :  { %v1227_v12 = vadd.f32 %v1225_v11, %v1217_v10 }
0x1c98   :  { %1513 = vtanh.f32 %v1227_v12 }
0x1c9d   :  { %v694_v13 = vpop.permute.xlu1 %693 }
0x1c9e   :  { %v1514_v14 = vpop.eup %1513  ;;  %697 = vst.msk [vmem:[#allocation3 + $0x38] sm:$0xff] %vm155_vm5, %v694_v13 }
0x1c9f   :  { %1230 = vrot.lane.b32.xlu0 %v1514_v14, %s1581_s12 }
0x1ca5   :  { %v714_v1 = vld [vmem:[#allocation3 + $0x38] sm:$0xff] }
0x1ca6   :  { %1368 = vmatmul.msk.f32.gmra.mxu3 %vm155_vm5, %v714_v1 }
0x1d11   :  { %v1231_v3 = vpop.permute.xlu0 %1230 }
0x1d12   :  { %v1233_v7 = vmul.f32 %v1231_v3, %v1214_v59 }
0x1d14   :  { %1236 = vrot.lane.b32.xlu2 %v1233_v7, %s1582_s13 }
0x1d29   :  { %v780_v16 = vpop.f32.mrf.mxu3 }
0x1d2a   :  { %v781_v9 = vadd.f32 %v1844_v15, %v780_v16 }
0x1d6e   :  { %v1237_v4 = vpop.permute.xlu2 %1236 }
0x1d6f   :  { %1382 = vmatmul.msk.f32.vlgmr.msrb.gmra.mxu2 %vm155_vm5, %v1237_v4 }
0x1df2   :  { %v1257_v17 = vpop.f32.mrf.mxu2 }
0x1df3   :  { %v1260_v18 = vadd.f32 %v1257_v17, %v781_v9 }
0x1df5   :  { %1515 = vtanh.f32 %v1260_v18  ;;  %v1383_v2 = vmul.f32 -1.442695, %v1260_v18 }
0x1df7   :  { %1517 = vpow2.f32 %v1383_v2 }
0x1dfb   :  { %v1516_v0 = vpop.eup %1515 }
0x1dfc   :  { %1283 = vrot.lane.b32.xlu0 %v1516_v0, %s1581_s12 }
0x1dfd   :  { %v1518_v8 = vpop.eup %1517 }
0x1dfe   :  { %v1264_v5 = vadd.f32 1.0, %v1518_v8 }
0x1e00   :  { %1519 = vrcp.f32 %v1264_v5  ;;  %v1276_v21 = vand.u32 2147483648, %v1264_v5  ;;  %vm1270_vm3 = vweird.f32 %v1264_v5  ;;  %v1274_v15 = vand.u32 2147483647, %v1264_v5 }
0x1e02   :  { %v1277_v23 = vor.u32 1.1754944e-38, %v1276_v21  ;;  %vm1275_vm6 = vcmp.eq.f32.partialorder %v1274_v15, 8.507059e+37 }
0x1e06   :  { %v1520_v19 = vpop.eup %1519 }
0x1e07   :  { %v1266_v38 = vmul.f32 %v1520_v19, %v1264_v5  ;;  %vm1271_vm2 = vweird.f32 %v1520_v19 }
0x1e08   :  { %vm1272_vm4 = vmor %vm1270_vm3, %vm1271_vm2 }
0x1e09   :  { %v1267_v20 = vsub.f32 1.0, %v1266_v38 }
0x1e0b   :  { %v1268_v62 = vmul.f32 %v1520_v19, %v1267_v20 }
0x1e0d   :  { %v1269_v6 = vadd.f32 %v1520_v19, %v1268_v62 }
0x1e0f   :  { %v1273_v22 = vsel %vm1272_vm4, %v1520_v19, %v1269_v6 }
0x1e10   :  { %v1278_v25 = vsel %vm1275_vm6, %v1277_v23, %v1273_v22 }
0x1e11   :  { %v1281_v27 = vmul.f32 %v1278_v25, %v1227_v12 }
0x1e6e   :  { %v1284_v24 = vpop.permute.xlu0 %1283 }
0x1e6f   :  { %v1286_v26 = vmul.f32 %v1284_v24, %v1278_v25 }
0x1e71   :  { %1288 = vrot.lane.b32.xlu1 %v1286_v26, %s1581_s12 }
0x1ee3   :  { %v1289_v28 = vpop.permute.xlu1 %1288 }
0x1ee4   :  { %v1291_v29 = vadd.f32 %v1289_v28, %v1281_v27 }
0x1ee6   :  { %1521 = vtanh.f32 %v1291_v29 }
0x1eec   :  { %v1522_v30 = vpop.eup %1521 }
0x1eed   :  { %1294 = vrot.lane.b32.xlu2 %v1522_v30, %s1581_s12 }
0x1f47   :  { %v1295_v35 = vpop.permute.xlu2 %1294 }
0x1f48   :  { %v1297_v36 = vmul.f32 %v1295_v35, %v1278_v25 }
0x1f4a   :  { %1307 = vrot.lane.b32.xlu0 %v1297_v36, %s1582_s13 }
0x1fbc   :  { %v1308_v37 = vpop.permute.xlu0 %1307 }
0x1fbd   :  { %1384 = vmatmul.msk.f32.vlgmr.msrb.gmra.mxu1 %vm155_vm5, %v1308_v37 }
0x203a   :  { %v1328_v40 = vpop.f32.mrf.mxu1 }
0x203b   :  { %v1329_v41 = vadd.f32 %v1394_v39, %v1328_v40 }
0x203d   :  { %1331 = vst [vmem:[%s1951_s9] sm:$0xff] %v1329_v41 }
0x203e   :  { %1336 = vsyncpa [#allocation5], 1 }
0x203f   :  { %1337 = vsyncpa [#allocation7], 1 }

</bundles_post_ra>
